<compile_context>
chip_gen: v7x
topology: tpu7x:2x2x1
jax: 0.10.0
libtpu: 0.0.40
codegen_flags: <defaults>
</compile_context>

<pallas_src>
import functools
import math

import jax
import jax.numpy as jnp
from jax.experimental import pallas as pl
from jax.experimental.pallas import tpu as pltpu


_GELU_COEF = math.sqrt(2.0 / math.pi)


def _gelu_f32(x):
    # GPT-2 tanh-approx gelu in f32.  Cube factored as x*(1 + c*x*x) to save a VPU
    # multiply; tanh goes to the (single) EUP slot and hides under the MXU.
    u = x * x
    return 0.5 * x * (1.0 + jnp.tanh(_GELU_COEF * (x * (1.0 + 0.044715 * u))))


def _round_up(n, m):
    return ((n + m - 1) // m) * m


def _mlp_kernel(x_ref, wfc_ref, bfc_ref, wproj_ref, bproj_ref, o_ref, acc_ref,
                *, slab, n_slabs):
    # x_ref:     (tm, nx)       token tile, original input dtype
    # wfc_ref:   (nx, n_state)  c_fc weight, compute dtype (resident, single-buffered)
    # bfc_ref:   (1, n_state)   c_fc bias, f32
    # wproj_ref: (n_state, nx)  c_proj weight, compute dtype
    # bproj_ref: (1, nx)        c_proj bias, f32
    # o_ref:     (tm, nx)       output tile, original input dtype
    # acc_ref:   (tm, nx)       f32 accumulator scratch
    cdt = wfc_ref.dtype
    x = x_ref[...].astype(cdt)              # in-kernel cast; hides under the MXU
    acc_ref[...] = jnp.zeros_like(acc_ref)

    def slab_step(s, carry):
        off = s * slab
        if not isinstance(off, int):
            off = pl.multiple_of(off, slab)
        # c_fc slab: (tm, slab) with f32 accumulation on the MXU.
        h = jnp.dot(x, wfc_ref[:, pl.ds(off, slab)],
                    preferred_element_type=jnp.float32)
        h = h + bfc_ref[:, pl.ds(off, slab)].astype(jnp.float32)
        h = _gelu_f32(h)
        # c_proj slab contribution, accumulated in f32.
        acc_ref[...] += jnp.dot(h.astype(cdt), wproj_ref[pl.ds(off, slab), :],
                                preferred_element_type=jnp.float32)
        return carry

    if n_slabs == 1:
        slab_step(0, 0)
    else:
        jax.lax.fori_loop(0, n_slabs, slab_step, 0, unroll=True)

    o_ref[...] = (acc_ref[...] + bproj_ref[...].astype(jnp.float32)).astype(o_ref.dtype)


def _pick_slab(n_state, target=512):
    """Largest multiple of 128 dividing n_state that is <= target (else full dim)."""
    if n_state <= target:
        return n_state
    if n_state % 128 != 0:
        return n_state
    best = 128
    for cand in range(128, target + 1, 128):
        if n_state % cand == 0:
            best = cand
    return best


def _vmem_limit_bytes(tm, nx, n_state, slab, x_itemsize, w_itemsize):
    need = (
        4 * tm * nx * x_itemsize               # x / out tiles, double-buffered
        + 2 * nx * n_state * w_itemsize        # both weights, single-buffered
        + 8 * (n_state + nx)                   # f32 biases
        + tm * nx * 4                          # f32 accumulator scratch
        + 4 * tm * slab * 4                    # slab intermediates / spill room
    )
    need = int(need * 1.25) + (4 << 20)        # Mosaic internal-scratch headroom
    cap = 100 << 20                            # v5e/v6e have 128 MiB physical VMEM
    try:                                       # clamp to physical VMEM (v7x: 64 MiB)
        cap = int(getattr(pltpu.get_tpu_info(), "vmem_capacity_bytes", cap) * 7 // 8)
    except Exception:
        pass
    return int(max(32 << 20, min(need, cap)))


def mlp_forward(x, w_fc, b_fc, w_proj, b_proj, *, tm=512,
                compute_dtype=jnp.bfloat16, hidden_slab=None):
    """GPT-2 MLP forward: gelu(x @ W_fc + b_fc) @ W_proj + b_proj.

    x: (..., nx) -> (..., nx).  compute_dtype sets the MXU operand dtype
    (default bf16); accumulation, bias adds and GELU are f32; output keeps
    x.dtype.  Pass compute_dtype=None for exact input-dtype operands.
    """
    orig_shape = x.shape
    orig_dtype = x.dtype
    nx = orig_shape[-1]
    n_state = w_fc.shape[1]
    assert w_fc.shape == (nx, n_state) and w_proj.shape == (n_state, nx)

    x2d = x.reshape(-1, nx)
    M = x2d.shape[0]

    cdt = jnp.dtype(orig_dtype if compute_dtype is None else compute_dtype)
    # Only weights are pre-cast (amortized); activation cast happens in-kernel.
    w_fc_c = w_fc.astype(cdt)
    w_proj_c = w_proj.astype(cdt)
    b_fc2 = b_fc.reshape(1, n_state).astype(jnp.float32)
    b_proj2 = b_proj.reshape(1, nx).astype(jnp.float32)

    # Hidden-dim slab size: multiple of 128 that divides n_state, <= 512.
    slab = hidden_slab if hidden_slab is not None else _pick_slab(n_state)
    if n_state % slab != 0 or (slab < n_state and slab % 128 != 0):
        slab = n_state
    n_slabs = n_state // slab

    # Token tile: sublane alignment depends on operand packing (8 rows for 32-bit,
    # 16 for bf16, 32 for 8-bit).  Cap at ceil(M/2) so a 2-TC chip (v7x) gets at
    # least two grid steps to shard across its cores.
    align = max(8, 32 // cdt.itemsize)
    tm_eff = max(align, min(_round_up(tm, align), _round_up(M, align)))
    if M >= 2 * align:
        tm_eff = min(tm_eff, _round_up((M + 1) // 2, align))
    grid = (pl.cdiv(M, tm_eff),)               # partial last block is masked by Pallas

    vmem_limit = _vmem_limit_bytes(tm_eff, nx, n_state, slab,
                                   jnp.dtype(orig_dtype).itemsize, cdt.itemsize)

    kernel = functools.partial(_mlp_kernel, slab=slab, n_slabs=n_slabs)

    def _call(single_buffer_weights):
        # Constant-index weight/bias blocks don't need double buffers; single
        # buffering halves their VMEM footprint (matters most on v7x's 64 MiB).
        wmode = dict(pipeline_mode=pl.Buffered(1)) if single_buffer_weights else {}
        in_specs = [
            pl.BlockSpec((tm_eff, nx), lambda i: (i, 0)),              # x tile
            pl.BlockSpec((nx, n_state), lambda i: (0, 0), **wmode),    # W_fc
            pl.BlockSpec((1, n_state), lambda i: (0, 0), **wmode),     # b_fc
            pl.BlockSpec((n_state, nx), lambda i: (0, 0), **wmode),    # W_proj
            pl.BlockSpec((1, nx), lambda i: (0, 0), **wmode),          # b_proj
        ]
        out_specs = pl.BlockSpec((tm_eff, nx), lambda i: (i, 0))
        return pl.pallas_call(
            kernel,
            out_shape=jax.ShapeDtypeStruct((M, nx), orig_dtype),
            grid_spec=pltpu.PrefetchScalarGridSpec(
                num_scalar_prefetch=0,
                grid=grid,
                in_specs=in_specs,
                out_specs=out_specs,
                scratch_shapes=[pltpu.VMEM((tm_eff, nx), jnp.float32)],
            ),
            compiler_params=pltpu.CompilerParams(
                dimension_semantics=("parallel",),  # token axis shards across TCs
                vmem_limit_bytes=vmem_limit,
            ),
        )(x2d, w_fc_c, b_fc2, w_proj_c, b_proj2)

    try:
        out = _call(single_buffer_weights=True)
    except Exception:
        # Fallback if this JAX/Mosaic build rejects single-buffered blocks.
        out = _call(single_buffer_weights=False)

    return out.reshape(orig_shape)


def _ref_mlp(x, w_fc, b_fc, w_proj, b_proj):
    nx = x.shape[-1]
    xf = x.reshape(-1, nx).astype(jnp.float32)
    h = _gelu_f32(xf @ w_fc + b_fc)
    out = h @ w_proj + b_proj
    return out.reshape(x.shape)


if __name__ == "__main__":
    # Small GPT-2-style config (lane-dense feature dim): n_embd=128, n_state=512.
    batch, seq, n_embd = 2, 8, 128
    n_state = 4 * n_embd

    key = jax.random.PRNGKey(0)
    k_x, k_x2, k_wfc, k_wproj = jax.random.split(key, 4)

    x = jax.random.normal(k_x, (batch, seq, n_embd), dtype=jnp.float32)
    # Conv1D init: weight ~ N(0, 0.02), bias = 0  (weight shape = (nx, nf)).
    w_fc = 0.02 * jax.random.normal(k_wfc, (n_embd, n_state), dtype=jnp.float32)
    b_fc = jnp.zeros((n_state,), dtype=jnp.float32)
    w_proj = 0.02 * jax.random.normal(k_wproj, (n_state, n_embd), dtype=jnp.float32)
    b_proj = jnp.zeros((n_embd,), dtype=jnp.float32)

    ref = _ref_mlp(x, w_fc, b_fc, w_proj, b_proj)

    # 1) Exact input-dtype (f32) MXU operands, tight tolerance vs reference.
    out_f32 = jax.block_until_ready(
        mlp_forward(x, w_fc, b_fc, w_proj, b_proj, compute_dtype=None))
    assert jnp.allclose(out_f32, ref, atol=1e-5, rtol=1e-5), "f32 mismatch vs reference"

    # 2) Default path: bf16 MXU operands, f32 accumulation / f32 GELU.
    out_bf16 = jax.block_until_ready(mlp_forward(x, w_fc, b_fc, w_proj, b_proj))
    assert jnp.allclose(out_bf16, ref, atol=3e-2, rtol=3e-2), "bf16 mismatch"

    # 3) Odd token count: exercises the masked partial last block (no padding).
    x_odd = jax.random.normal(k_x2, (3, 5, n_embd), dtype=jnp.float32)
    out_odd = jax.block_until_ready(
        mlp_forward(x_odd, w_fc, b_fc, w_proj, b_proj, compute_dtype=None))
    ref_odd = _ref_mlp(x_odd, w_fc, b_fc, w_proj, b_proj)
    assert jnp.allclose(out_odd, ref_odd, atol=1e-5, rtol=1e-5), "odd-M mismatch"

    # 4) Hidden-dim slab chunking (4 slabs of 128), f32, tight tolerance.
    out_slab = jax.block_until_ready(
        mlp_forward(x, w_fc, b_fc, w_proj, b_proj, compute_dtype=None,
                    hidden_slab=128))
    assert jnp.allclose(out_slab, ref, atol=1e-5, rtol=1e-5), "slab-chunked mismatch"

    print("KERNEL_OK")
</pallas_src>

<mosaic_0001>
module attributes {stable_mosaic.version = 11 : i64} {
  func.func @_mlp_kernel(%arg0: i32, %arg1: memref<8x128xf32, #tpu.memory_space<vmem>>, %arg2: memref<128x512xf32, #tpu.memory_space<vmem>>, %arg3: memref<1x512xf32, #tpu.memory_space<vmem>>, %arg4: memref<512x128xf32, #tpu.memory_space<vmem>>, %arg5: memref<1x128xf32, #tpu.memory_space<vmem>>, %arg6: memref<8x128xf32, #tpu.memory_space<vmem>>, %arg7: memref<8x128xf32, #tpu.memory_space<vmem>>) attributes {dimension_semantics = [#tpu.dimension_semantics<parallel>], iteration_bounds = array<i64: 2>, scalar_prefetch = 0 : i64, scratch_operands = 1 : i64, tpu.core_type = #tpu.core_type<tc>, window_params = [{transform_indices = @transform_0, window_bounds = array<i64: 8, 128>}, {pipeline_mode = #tpu.pipeline_mode<synchronous>, transform_indices = @transform_1, window_bounds = array<i64: 128, 512>}, {pipeline_mode = #tpu.pipeline_mode<synchronous>, transform_indices = @transform_2, window_bounds = array<i64: 1, 512>}, {pipeline_mode = #tpu.pipeline_mode<synchronous>, transform_indices = @transform_3, window_bounds = array<i64: 512, 128>}, {pipeline_mode = #tpu.pipeline_mode<synchronous>, transform_indices = @transform_4, window_bounds = array<i64: 1, 128>}, {transform_indices = @transform_5, window_bounds = array<i64: 8, 128>}]} {
    %c0 = arith.constant 0 : index
    %c0_0 = arith.constant 0 : index
    %0 = vector.load %arg1[%c0, %c0_0] : memref<8x128xf32, #tpu.memory_space<vmem>>, vector<8x128xf32>
    %cst = arith.constant 0.000000e+00 : f32
    %1 = vector.broadcast %cst : f32 to vector<8x128xf32>
    %c0_1 = arith.constant 0 : index
    %c0_2 = arith.constant 0 : index
    %2 = vector.load %arg7[%c0_1, %c0_2] : memref<8x128xf32, #tpu.memory_space<vmem>>, vector<8x128xf32>
    tpu.vector_store %arg7[%c0_1, %c0_2], %1 {strides = array<i32>} : memref<8x128xf32, #tpu.memory_space<vmem>>, vector<8x128xf32>,
    %c0_3 = arith.constant 0 : index
    %c0_4 = arith.constant 0 : index
    %3 = vector.load %arg2[%c0_3, %c0_4] : memref<128x512xf32, #tpu.memory_space<vmem>>, vector<128x512xf32>
    %cst_5 = arith.constant dense<0.000000e+00> : vector<8x512xf32>
    %4 = tpu.matmul %0, %3, %cst_5 {dimension_numbers = #tpu.dot_dimension_numbers<[1], [0], [0], [1], [0, 0, 1, 1], [], []>} : vector<8x128xf32>, vector<128x512xf32>, vector<8x512xf32> -> vector<8x512xf32>
    %c0_6 = arith.constant 0 : index
    %c0_7 = arith.constant 0 : index
    %5 = vector.load %arg3[%c0_6, %c0_7] : memref<1x512xf32, #tpu.memory_space<vmem>>, vector<1x512xf32>
    %6 = vector.broadcast %5 : vector<1x512xf32> to vector<8x512xf32>
    %7 = arith.addf %4, %6 : vector<8x512xf32>
    %8 = arith.mulf %7, %7 : vector<8x512xf32>
    %cst_8 = arith.constant 5.000000e-01 : f32
    %9 = vector.broadcast %cst_8 : f32 to vector<8x512xf32>
    %10 = arith.mulf %9, %7 : vector<8x512xf32>
    %cst_9 = arith.constant 4.471500e-02 : f32
    %11 = vector.broadcast %cst_9 : f32 to vector<8x512xf32>
    %12 = arith.mulf %11, %8 : vector<8x512xf32>
    %cst_10 = arith.constant 1.000000e+00 : f32
    %13 = vector.broadcast %cst_10 : f32 to vector<8x512xf32>
    %14 = arith.addf %13, %12 : vector<8x512xf32>
    %15 = arith.mulf %7, %14 : vector<8x512xf32>
    %cst_11 = arith.constant 0.797884583 : f32
    %16 = vector.broadcast %cst_11 : f32 to vector<8x512xf32>
    %17 = arith.mulf %16, %15 : vector<8x512xf32>
    %18 = math.tanh %17 : vector<8x512xf32>
    %cst_12 = arith.constant 1.000000e+00 : f32
    %19 = vector.broadcast %cst_12 : f32 to vector<8x512xf32>
    %20 = arith.addf %19, %18 : vector<8x512xf32>
    %21 = arith.mulf %10, %20 : vector<8x512xf32>
    %c0_13 = arith.constant 0 : index
    %c0_14 = arith.constant 0 : index
    %22 = vector.load %arg7[%c0_13, %c0_14] : memref<8x128xf32, #tpu.memory_space<vmem>>, vector<8x128xf32>
    %c0_15 = arith.constant 0 : index
    %c0_16 = arith.constant 0 : index
    %23 = vector.load %arg4[%c0_15, %c0_16] : memref<512x128xf32, #tpu.memory_space<vmem>>, vector<512x128xf32>
    %cst_17 = arith.constant dense<0.000000e+00> : vector<8x128xf32>
    %24 = tpu.matmul %21, %23, %cst_17 {dimension_numbers = #tpu.dot_dimension_numbers<[1], [0], [0], [1], [0, 0, 1, 1], [], []>} : vector<8x512xf32>, vector<512x128xf32>, vector<8x128xf32> -> vector<8x128xf32>
    %25 = arith.addf %22, %24 : vector<8x128xf32>
    %c0_18 = arith.constant 0 : index
    %c0_19 = arith.constant 0 : index
    %26 = vector.load %arg7[%c0_18, %c0_19] : memref<8x128xf32, #tpu.memory_space<vmem>>, vector<8x128xf32>
    tpu.vector_store %arg7[%c0_18, %c0_19], %25 {strides = array<i32>} : memref<8x128xf32, #tpu.memory_space<vmem>>, vector<8x128xf32>,
    %c0_20 = arith.constant 0 : index
    %c0_21 = arith.constant 0 : index
    %27 = vector.load %arg7[%c0_20, %c0_21] : memref<8x128xf32, #tpu.memory_space<vmem>>, vector<8x128xf32>
    %c0_22 = arith.constant 0 : index
    %c0_23 = arith.constant 0 : index
    %28 = vector.load %arg5[%c0_22, %c0_23] : memref<1x128xf32, #tpu.memory_space<vmem>>, vector<1x128xf32>
    %29 = vector.broadcast %28 : vector<1x128xf32> to vector<8x128xf32>
    %30 = arith.addf %27, %29 : vector<8x128xf32>
    %c0_24 = arith.constant 0 : index
    %c0_25 = arith.constant 0 : index
    %31 = vector.load %arg6[%c0_24, %c0_25] : memref<8x128xf32, #tpu.memory_space<vmem>>, vector<8x128xf32>
    tpu.vector_store %arg6[%c0_24, %c0_25], %30 {strides = array<i32>} : memref<8x128xf32, #tpu.memory_space<vmem>>, vector<8x128xf32>,
    return
  }
  func.func @transform_0(%arg0: i32) -> (i32, i32) {
    %c0_i32 = arith.constant 0 : i32
    %c0_i32_0 = arith.constant 0 : i32
    return %arg0, %c0_i32 : i32, i32
  }
  func.func @transform_1(%arg0: i32) -> (i32, i32) {
    %c0_i32 = arith.constant 0 : i32
    %c0_i32_0 = arith.constant 0 : i32
    %c0_i32_1 = arith.constant 0 : i32
    return %c0_i32, %c0_i32_0 : i32, i32
  }
  func.func @transform_2(%arg0: i32) -> (i32, i32) {
    %c0_i32 = arith.constant 0 : i32
    %c0_i32_0 = arith.constant 0 : i32
    %c0_i32_1 = arith.constant 0 : i32
    return %c0_i32, %c0_i32_0 : i32, i32
  }
  func.func @transform_3(%arg0: i32) -> (i32, i32) {
    %c0_i32 = arith.constant 0 : i32
    %c0_i32_0 = arith.constant 0 : i32
    %c0_i32_1 = arith.constant 0 : i32
    return %c0_i32, %c0_i32_0 : i32, i32
  }
  func.func @transform_4(%arg0: i32) -> (i32, i32) {
    %c0_i32 = arith.constant 0 : i32
    %c0_i32_0 = arith.constant 0 : i32
    %c0_i32_1 = arith.constant 0 : i32
    return %c0_i32, %c0_i32_0 : i32, i32
  }
  func.func @transform_5(%arg0: i32) -> (i32, i32) {
    %c0_i32 = arith.constant 0 : i32
    %c0_i32_0 = arith.constant 0 : i32
    return %arg0, %c0_i32 : i32, i32
  }
}

module attributes {stable_mosaic.version = 11 : i64} {
  func.func @_mlp_kernel(%arg0: i32, %arg1: memref<8x128xf32, #tpu.memory_space<vmem>>, %arg2: memref<128x512xf32, #tpu.memory_space<vmem>>, %arg3: memref<1x512xf32, #tpu.memory_space<vmem>>, %arg4: memref<512x128xf32, #tpu.memory_space<vmem>>, %arg5: memref<1x128xf32, #tpu.memory_space<vmem>>, %arg6: memref<8x128xf32, #tpu.memory_space<vmem>>, %arg7: memref<8x128xf32, #tpu.memory_space<vmem>>) attributes {dimension_semantics = [#tpu.dimension_semantics<parallel>], iteration_bounds = array<i64: 2>, scalar_prefetch = 0 : i64, scratch_operands = 1 : i64, tpu.core_type = #tpu.core_type<tc>, window_params = [{transform_indices = @transform_0, window_bounds = array<i64: 8, 128>}, {pipeline_mode = #tpu.pipeline_mode<synchronous>, transform_indices = @transform_1, window_bounds = array<i64: 128, 512>}, {pipeline_mode = #tpu.pipeline_mode<synchronous>, transform_indices = @transform_2, window_bounds = array<i64: 1, 512>}, {pipeline_mode = #tpu.pipeline_mode<synchronous>, transform_indices = @transform_3, window_bounds = array<i64: 512, 128>}, {pipeline_mode = #tpu.pipeline_mode<synchronous>, transform_indices = @transform_4, window_bounds = array<i64: 1, 128>}, {transform_indices = @transform_5, window_bounds = array<i64: 8, 128>}]} {
    %c0 = arith.constant 0 : index
    %c0_0 = arith.constant 0 : index
    %0 = vector.load %arg1[%c0, %c0_0] : memref<8x128xf32, #tpu.memory_space<vmem>>, vector<8x128xf32>
    %cst = arith.constant 0.000000e+00 : f32
    %1 = vector.broadcast %cst : f32 to vector<8x128xf32>
    %c0_1 = arith.constant 0 : index
    %c0_2 = arith.constant 0 : index
    %2 = vector.load %arg7[%c0_1, %c0_2] : memref<8x128xf32, #tpu.memory_space<vmem>>, vector<8x128xf32>
    tpu.vector_store %arg7[%c0_1, %c0_2], %1 {strides = array<i32>} : memref<8x128xf32, #tpu.memory_space<vmem>>, vector<8x128xf32>,
    %c0_3 = arith.constant 0 : index
    %c0_4 = arith.constant 0 : index
    %3 = vector.load %arg2[%c0_3, %c0_4] : memref<128x512xf32, #tpu.memory_space<vmem>>, vector<128x512xf32>
    %cst_5 = arith.constant dense<0.000000e+00> : vector<8x512xf32>
    %4 = tpu.matmul %0, %3, %cst_5 {dimension_numbers = #tpu.dot_dimension_numbers<[1], [0], [0], [1], [0, 0, 1, 1], [], []>} : vector<8x128xf32>, vector<128x512xf32>, vector<8x512xf32> -> vector<8x512xf32>
    %c0_6 = arith.constant 0 : index
    %c0_7 = arith.constant 0 : index
    %5 = vector.load %arg3[%c0_6, %c0_7] : memref<1x512xf32, #tpu.memory_space<vmem>>, vector<1x512xf32>
    %6 = vector.broadcast %5 : vector<1x512xf32> to vector<8x512xf32>
    %7 = arith.addf %4, %6 : vector<8x512xf32>
    %8 = arith.mulf %7, %7 : vector<8x512xf32>
    %cst_8 = arith.constant 5.000000e-01 : f32
    %9 = vector.broadcast %cst_8 : f32 to vector<8x512xf32>
    %10 = arith.mulf %9, %7 : vector<8x512xf32>
    %cst_9 = arith.constant 4.471500e-02 : f32
    %11 = vector.broadcast %cst_9 : f32 to vector<8x512xf32>
    %12 = arith.mulf %11, %8 : vector<8x512xf32>
    %cst_10 = arith.constant 1.000000e+00 : f32
    %13 = vector.broadcast %cst_10 : f32 to vector<8x512xf32>
    %14 = arith.addf %13, %12 : vector<8x512xf32>
    %15 = arith.mulf %7, %14 : vector<8x512xf32>
    %cst_11 = arith.constant 0.797884583 : f32
    %16 = vector.broadcast %cst_11 : f32 to vector<8x512xf32>
    %17 = arith.mulf %16, %15 : vector<8x512xf32>
    %18 = math.tanh %17 : vector<8x512xf32>
    %cst_12 = arith.constant 1.000000e+00 : f32
    %19 = vector.broadcast %cst_12 : f32 to vector<8x512xf32>
    %20 = arith.addf %19, %18 : vector<8x512xf32>
    %21 = arith.mulf %10, %20 : vector<8x512xf32>
    %c0_13 = arith.constant 0 : index
    %c0_14 = arith.constant 0 : index
    %22 = vector.load %arg7[%c0_13, %c0_14] : memref<8x128xf32, #tpu.memory_space<vmem>>, vector<8x128xf32>
    %c0_15 = arith.constant 0 : index
    %c0_16 = arith.constant 0 : index
    %23 = vector.load %arg4[%c0_15, %c0_16] : memref<512x128xf32, #tpu.memory_space<vmem>>, vector<512x128xf32>
    %cst_17 = arith.constant dense<0.000000e+00> : vector<8x128xf32>
    %24 = tpu.matmul %21, %23, %cst_17 {dimension_numbers = #tpu.dot_dimension_numbers<[1], [0], [0], [1], [0, 0, 1, 1], [], []>} : vector<8x512xf32>, vector<512x128xf32>, vector<8x128xf32> -> vector<8x128xf32>
    %25 = arith.addf %22, %24 : vector<8x128xf32>
    %c0_18 = arith.constant 0 : index
    %c0_19 = arith.constant 0 : index
    %26 = vector.load %arg7[%c0_18, %c0_19] : memref<8x128xf32, #tpu.memory_space<vmem>>, vector<8x128xf32>
    tpu.vector_store %arg7[%c0_18, %c0_19], %25 {strides = array<i32>} : memref<8x128xf32, #tpu.memory_space<vmem>>, vector<8x128xf32>,
    %c0_20 = arith.constant 0 : index
    %c0_21 = arith.constant 0 : index
    %27 = vector.load %arg7[%c0_20, %c0_21] : memref<8x128xf32, #tpu.memory_space<vmem>>, vector<8x128xf32>
    %c0_22 = arith.constant 0 : index
    %c0_23 = arith.constant 0 : index
    %28 = vector.load %arg5[%c0_22, %c0_23] : memref<1x128xf32, #tpu.memory_space<vmem>>, vector<1x128xf32>
    %29 = vector.broadcast %28 : vector<1x128xf32> to vector<8x128xf32>
    %30 = arith.addf %27, %29 : vector<8x128xf32>
    %c0_24 = arith.constant 0 : index
    %c0_25 = arith.constant 0 : index
    %31 = vector.load %arg6[%c0_24, %c0_25] : memref<8x128xf32, #tpu.memory_space<vmem>>, vector<8x128xf32>
    tpu.vector_store %arg6[%c0_24, %c0_25], %30 {strides = array<i32>} : memref<8x128xf32, #tpu.memory_space<vmem>>, vector<8x128xf32>,
    return
  }
  func.func @transform_0(%arg0: i32) -> (i32, i32) {
    %c0_i32 = arith.constant 0 : i32
    %c0_i32_0 = arith.constant 0 : i32
    return %arg0, %c0_i32 : i32, i32
  }
  func.func @transform_1(%arg0: i32) -> (i32, i32) {
    %c0_i32 = arith.constant 0 : i32
    %c0_i32_0 = arith.constant 0 : i32
    %c0_i32_1 = arith.constant 0 : i32
    return %c0_i32, %c0_i32_0 : i32, i32
  }
  func.func @transform_2(%arg0: i32) -> (i32, i32) {
    %c0_i32 = arith.constant 0 : i32
    %c0_i32_0 = arith.constant 0 : i32
    %c0_i32_1 = arith.constant 0 : i32
    return %c0_i32, %c0_i32_0 : i32, i32
  }
  func.func @transform_3(%arg0: i32) -> (i32, i32) {
    %c0_i32 = arith.constant 0 : i32
    %c0_i32_0 = arith.constant 0 : i32
    %c0_i32_1 = arith.constant 0 : i32
    return %c0_i32, %c0_i32_0 : i32, i32
  }
  func.func @transform_4(%arg0: i32) -> (i32, i32) {
    %c0_i32 = arith.constant 0 : i32
    %c0_i32_0 = arith.constant 0 : i32
    %c0_i32_1 = arith.constant 0 : i32
    return %c0_i32, %c0_i32_0 : i32, i32
  }
  func.func @transform_5(%arg0: i32) -> (i32, i32) {
    %c0_i32 = arith.constant 0 : i32
    %c0_i32_0 = arith.constant 0 : i32
    return %arg0, %c0_i32 : i32, i32
  }
}

</mosaic_0001>

<bundles_post_ra>
// kernel: tpu_custom_call.1
= control target key start
LH: loop header
LB: loop body
LE: loop exit
PB: predicated region body
PF: predicated region fallthrough
CT: control target
= control target key end

     0   :  { %10 = vsyncpa [#allocation4], 0  ;;  %s1589_s0 = inlined_call_operand.hbm [shape: f32[16,128], index: 0, kind: input, shape index: {}]   ;;  %s1590_s1 = inlined_call_operand.hbm [shape: f32[128,512], index: 1, kind: input, shape index: {}]   ;;  %s1591_s2 = inlined_call_operand.vmem [shape: f32[1,512], index: 2, kind: input, shape index: {}]   ;;  %s1592_s3 = inlined_call_operand.hbm [shape: f32[512,128], index: 3, kind: input, shape index: {}]   ;;  %s1593_s4 = inlined_call_operand.vmem [shape: f32[1,128], index: 4, kind: input, shape index: {}]   ;;  %s1594_s5 = inlined_call_operand.hbm [shape: f32[16,128], index: 5, kind: output, shape index: {}]  }
   0x1   :  { %12 = vsyncpa [#allocation4 + $0x1], 0 }
   0x2   :  { %13 = vsyncpa [#allocation7], 0 }
   0x3   :  { %14 = vsyncpa [#allocation5], 0 }
   0x4   :  { %16 = vsyncpa [#allocation5 + $0x1], 0  ;;  %s1347_s18 = smov 0   ;;  %s1349_s19 = smov 0  }
   0x5   :  { %s1351_s20 = smov 0   ;;  %s1353_s21 = smov 0  }
   0x6 LB: > { %s1368_s22 = sadd.s32 4294967295, %s1306_s21   ;;  %s855_s23 = sadd.s32 4294967294, %s1306_s21   ;;  %s1306_s21 = sphi %s1353_s21, %s1614_s21   ;;  %s1302_s20 = sphi %s1351_s20, %s1613_s20   ;;  %s1298_s19 = sphi %s1349_s19, %s1612_s19   ;;  %s1294_s18 = sphi %s1347_s18, %s1611_s18  }
   0x7   : > { %p42_p0 = scmp.ne.s32.totalorder %s1298_s19, %s1294_s18  ;;  %p1595_p1 = scmp.eq.s32.totalorder %s1368_s22, 0 }
   0x8   : > { %p156_p3 = scmp.eq.s32.totalorder %s855_s23, 1  ;;  %p856_p5 = scmp.ge.s32.totalorder %s1306_s21, 1 }
   0x9   : > { %p1377_p4 = por %p1595_p1, %p42_p0  ;;  %p163_p7 = scmp.lt.s32.totalorder %s1306_s21, 3 }
   0xa   : > { %p1382_p6 = por %p156_p3, %p42_p0  ;;  %s1308_s27 = smov [#allocation6]  }
   0xb   : > { %s1598_s24 = scalar_select %p1377_p4, 1, 0 }
   0xc   : > { %s1599_s25 = scalar_select %p1382_p6, 1, 0 }
   0xd   : > { %p1387_p8 = pnand %p856_p5, %p163_p7  ;;  %s175_s28 = sshll.u32 %s1308_s27, 4  ;;  %s1391_s28 = int_to_ptr.vmem [resolvable:$true] %s175_s28 }
   0xe   : > { %s1309_s30 = smov [#allocation8]   ;;  %s1150_s9 = scalar_lea.hbm %s1590_s1, 8192 }
   0xf   : > { %p1082_p9 = pneg %p1387_p8  ;;  %s191_s6 = sshll.u32 %s1309_s30, 4  ;;  %s1402_s6 = int_to_ptr.vmem [resolvable:$true] %s191_s6 }
  0x10   : > { %p1151_p12 = scmp.ne.s32.totalorder %s1590_s1, %s1150_s9  ;;  %p1157_p5 = scmp.lt.u32.totalorder %s1150_s9, %s1590_s1 }
  0x11   : > { %p1398_p11 = pnand %p1082_p9, %p1595_p1 }
  0x13   : > { %p1152_p13 = pneg %p1398_p11 }
  0x15   : > { %p1153_p0 = pnand %p1152_p13, %p1151_p12 }
  0x17   : > { %p1154_p3 = pneg %p1153_p0 }
  0x19   : > { %p1159_p7 = pnand %p1157_p5, %p1154_p3 }
  0x1b   : > { %1162 = shalt.err (!%p1159_p7)
}
  0x1c   : > { %s1163_s14 = scalar_lea.vmem %s1391_s28, 8192  ;;  %p1171_p2 = scmp.lt.s32.totalorder %s1391_s28, %s1391_s28 }
  0x1d   : > { %p1164_p9 = scmp.ne.s32.totalorder %s1391_s28, %s1163_s14  ;;  %p1172_p12 = scmp.lt.s32.totalorder %s1163_s14, %s1163_s14 }
  0x1f   : > { %p1166_p10 = pnand %p1164_p9, %p1152_p13  ;;  %p1173_p0 = por %p1172_p12, %p1171_p2 }
  0x21   : > { %p1167_p1 = pneg %p1166_p10 }
  0x23   : > { %p1174_p6 = pnand %p1173_p0, %p1167_p1 }
  0x25   : > { %1177 = shalt.err (!%p1174_p6)
}
  0x26   : > { %s1310_s15 = smov 512   ;;  %s1311_s16 = smov 32  }
  0x27   : > { %1085 = dma.hbm_to_vmem [thread:$0]  (!%p1398_p11), %s1590_s1, 8192, %s1391_s28, [#allocation7], %s1310_s15, %s1310_s15, %s1311_s16  }
  0x28   : > { %s1178_s7 = scalar_lea.hbm %s1592_s3, 8192 }
  0x29   : > { %p1179_p2 = scmp.ne.s32.totalorder %s1592_s3, %s1178_s7  ;;  %p1185_p10 = scmp.lt.u32.totalorder %s1178_s7, %s1592_s3 }
  0x2b   : > { %p1181_p1 = pnand %p1179_p2, %p1152_p13 }
  0x2d   : > { %p1182_p6 = pneg %p1181_p1 }
  0x2f   : > { %p1187_p3 = pnand %p1185_p10, %p1182_p6 }
  0x31   : > { %1190 = shalt.err (!%p1187_p3)
}
  0x32   : > { %s1191_s28 = scalar_lea.vmem %s1402_s6, 8192  ;;  %p1199_p12 = scmp.lt.s32.totalorder %s1402_s6, %s1402_s6 }
  0x33   : > { %p1192_p5 = scmp.ne.s32.totalorder %s1402_s6, %s1191_s28  ;;  %p1200_p0 = scmp.lt.s32.totalorder %s1191_s28, %s1191_s28 }
  0x35   : > { %p1194_p7 = pnand %p1192_p5, %p1152_p13  ;;  %p1201_p2 = por %p1200_p0, %p1199_p12 }
  0x37   : > { %p1195_p9 = pneg %p1194_p7 }
  0x39   : > { %p1202_p1 = pnand %p1201_p2, %p1195_p9 }
  0x3b   : > { %1205 = shalt.err (!%p1202_p1)
}
  0x3c   : > { %s1312_s12 = smov 128   ;;  %s1313_s13 = smov 8  }
  0x3d   : > { %1088 = dma.hbm_to_vmem [thread:$0]  (!%p1398_p11), %s1592_s3, 8192, %s1402_s6, [#allocation7], %s1312_s12, %s1312_s12, %s1313_s13  }
  0x3e   : > { %s1457_s16 = sadd.s32 1, %s1306_s21   ;;  %s29_s23 = sadd.s32 1, %s1302_s20 }
  0x3f   : > { %s26_s17 = ssub.s32 %s1306_s21, %s1457_s16  ;;  %p36_p6 = scmp.ne.s32.totalorder %s1302_s20, %s1298_s19 }
  0x40   : > { %p27_p13 = scmp.eq.s32.totalorder %s26_s17, 0  ;;  %p37_p10 = scmp.eq.s32.totalorder %s1306_s21, 0 }
  0x41   : > { %p1602_p5 = scmp.eq.s32.totalorder %s1368_s22, 1  ;;  %p1099_p9 = scmp.lt.s32.totalorder %s1306_s21, 2 }
  0x42   : > { %s1466_s27 = scalar_select %p27_p13, %s1302_s20, %s29_s23  }
  0x43   : > { %p38_p3 = por %p37_p10, %p36_p6  ;;  %p1470_p7 = por %p1602_p5, %p36_p6 }
  0x44   : > { %s208_s29 = sand.u32 1, %s1302_s20   ;;  %s861_s6 = sshll.u32 %s1306_s21, 7 }
  0x45   : > { %s1603_s30 = scalar_select %p1470_p7, 1, 0 }
  0x46   : > { %s860_s7 = sshll.u32 %s208_s29, 3  ;;  %s1480_s10 = scalar_lea.hbm %s1589_s0, %s861_s6 }
  0x47   : > { %s212_s11 = scalar_lea.vmem [#allocation3], %s860_s7  ;;  %p1484_p11 = pnand %p1099_p9, %p38_p3 }
  0x48   : > { %s219_s28 = sshll.u32 %s212_s11, 4  ;;  %s209_s13 = scalar_lea.sflag [#allocation4], %s208_s29  ;;  %s1482_s28 = int_to_ptr.vmem [resolvable:$true] %s219_s28 }
  0x49   : > { %s1206_s14 = scalar_lea.hbm %s1480_s10, 128  ;;  %p1208_p0 = pneg %p1484_p11 }
  0x4a   : > { %p1207_p12 = scmp.ne.s32.totalorder %s1480_s10, %s1206_s14  ;;  %s1211_s23 = scalar_lea.hbm %s1589_s0, 256 }
  0x4b   : > { %p1212_p13 = scmp.lt.u32.totalorder %s1480_s10, %s1589_s0  ;;  %p1213_p6 = scmp.lt.u32.totalorder %s1211_s23, %s1206_s14 }
  0x4c   : > { %p1209_p2 = pnand %p1208_p0, %p1207_p12  ;;  %p1215_p3 = scmp.lt.u32.totalorder %s1206_s14, %s1480_s10 }
  0x4d   : > { %p1214_p10 = por %p1213_p6, %p1212_p13 }
  0x4e   : > { %p1210_p1 = pneg %p1209_p2 }
  0x4f   : > { %p1216_p5 = por %p1215_p3, %p1214_p10 }
  0x51   : > { %p1217_p9 = pnand %p1216_p5, %p1210_p1 }
  0x53   : > { %1220 = shalt.err (!%p1217_p9)
}
  0x54   : > { %s1221_s29 = scalar_lea.vmem %s1482_s28, 128  ;;  %s1314_s8 = smov [#allocation3]  }
  0x55   : > { %p1222_p12 = scmp.ne.s32.totalorder %s1482_s28, %s1221_s29  ;;  %s1226_s9 = sshll.u32 %s1314_s8, 4  ;;  %s1227_s9 = int_to_ptr.vmem [resolvable:$false] %s1226_s9 }
  0x56   : > { %s1228_s11 = scalar_lea.vmem %s1227_s9, 256  ;;  %p1229_p4 = scmp.lt.s32.totalorder %s1482_s28, %s1227_s9 }
  0x57   : > { %p1224_p2 = pnand %p1222_p12, %p1208_p0  ;;  %p1230_p13 = scmp.lt.s32.totalorder %s1228_s11, %s1221_s29 }
  0x59   : > { %p1225_p7 = pneg %p1224_p2  ;;  %p1231_p6 = por %p1230_p13, %p1229_p4 }
  0x5b   : > { %p1232_p10 = pnand %p1231_p6, %p1225_p7 }
  0x5d   : > { %1235 = shalt.err (!%p1232_p10)
}
  0x5e   : > { %1092 = dma.hbm_to_vmem [thread:$0]  (!%p1484_p11), %s1480_s10, 128, %s1482_s28, %s209_s13  }
  0x5f   : > { %228 = sbr.rel (%p1387_p8) target bundleno = 618 (0x26a), region = 40  ;;  %s1516_s14 = sand.u32 (!%p1387_p8), 1, %s1298_s19  }
  0x60   : > { %s863_s15 = sshll.u32 (!%p1387_p8), %s1516_s14, 3  ;;  %s231_s17 = scalar_lea.sflag (!%p1387_p8), [#allocation4], %s1516_s14 }
  0x61   : > { %s1522_s23 = scalar_lea.vmem (!%p1387_p8), [#allocation3], %s863_s15  ;;  %p1605_p4 = scmp.ne.s32.totalorder (!%p1387_p8), %s1598_s24, 0 }
  0x66   : > { %1281 = dma.done.wait (%p1605_p4), %s231_s17, 128  }
  0x67   : > { %1283 = vsyncadd (%p1605_p4), %s231_s17, 4294967168  ;;  %p1606_p7 = scmp.eq.s32.totalorder %s1368_s22, 0 }
  0x69   : > { %1285 = dma.done.wait (%p1606_p7), [#allocation7], 16384   ;;  %p1607_p8 = pmov %p1606_p7 }
  0x6a   : > { %v1315_v0 = vmov 0.0   ;;  %v272_v1 = vld [vmem:[#allocation6 + $0x8] sm:$0xff]  ;;  %v274_v3 = vld [vmem:[#allocation6 + $0x18] sm:$0xff]  ;;  %v271_v6 = vld [vmem:[#allocation6] sm:$0xff]  ;;  %s869_s12 = sshll.u32 %s1368_s22, 7  ;;  %s268_s13 = scalar_lea.vmem [#allocation9], %s863_s15 }
  0x6b   : > { %1287 = vsyncadd (%p1607_p8), [#allocation7], 4294950912  ;;  %421 = vmatprep.mubr.f32.mxu0 %v1315_v0  ;;  %492 = vmatprep.mubr.f32.mxu1 %v1315_v0  ;;  %v276_v2 = vld [vmem:[#allocation6 + $0x28] sm:$0xff]  ;;  %v278_v5 = vld [vmem:[#allocation6 + $0x38] sm:$0xff]  ;;  %s766_s7 = sshll.u32 %s268_s13, 4  ;;  %s1545_s8 = scalar_lea.hbm %s1594_s5, %s869_s12  ;;  %s1547_s7 = int_to_ptr.vmem [resolvable:$true] %s766_s7 }
  0x6c   : > { %v942_v4 = vpack.c.bf16 %v276_v2, %v272_v1  ;;  %v275_v7 = vld [vmem:[#allocation6 + $0x20] sm:$0xff]  ;;  %v974_v8 = vpack.c.bf16 %v278_v5, %v274_v3  ;;  %v273_v10 = vld [vmem:[#allocation6 + $0x10] sm:$0xff]  ;;  %v280_v12 = vld [vmem:[#allocation6 + $0x48] sm:$0xff]  ;;  %s753_s9 = scalar_lea.sflag [#allocation5], %s1516_s14  ;;  %s1236_s11 = scalar_lea.vmem %s1547_s7, 128 }
  0x6d   : > { %v944_v9 = vpack.c.bf16 %v275_v7, %v271_v6  ;;  %v277_v11 = vld [vmem:[#allocation6 + $0x30] sm:$0xff]  ;;  %v284_v14 = vld [vmem:[#allocation6 + $0x68] sm:$0xff]  ;;  %v282_v15 = vld [vmem:[#allocation6 + $0x58] sm:$0xff]  ;;  %p1237_p11 = scmp.ne.s32.totalorder %s1547_s7, %s1236_s11  ;;  %p1608_p0 = scmp.ne.s32.totalorder %s1603_s30, 0 }
  0x6e   : > { %943 = vmatprep.subr.bf16.mxu0 %v942_v4  ;;  %v976_v13 = vpack.c.bf16 %v277_v11, %v273_v10  ;;  %v286_v16 = vld [vmem:[#allocation6 + $0x78] sm:$0xff]  ;;  %975 = vmatprep.subr.bf16.mxu1 %v974_v8  ;;  %v946_v17 = vpack.c.bf16 %v284_v14, %v280_v12  ;;  %v279_v19 = vld [vmem:[#allocation6 + $0x40] sm:$0xff]  ;;  %v281_v21 = vld [vmem:[#allocation6 + $0x50] sm:$0xff]  ;;  %s1316_s22 = smov [#allocation9]  }
  0x6f   : > { %945 = vmatpush1.bf16.msra.mxu0 %v944_v9  ;;  %v978_v18 = vpack.c.bf16 %v286_v16, %v282_v15  ;;  %v283_v20 = vld [vmem:[#allocation6 + $0x60] sm:$0xff]  ;;  %v285_v23 = vld [vmem:[#allocation6 + $0x70] sm:$0xff]  ;;  %v288_v24 = vld [vmem:[#allocation6 + $0x88] sm:$0xff]  ;;  %p1238_p1 = pnand %p1237_p11, %p1608_p0  ;;  %s1240_s15 = sshll.u32 %s1316_s22, 4  ;;  %s1241_s15 = int_to_ptr.vmem [resolvable:$false] %s1240_s15 }
  0x70   : > { %977 = vmatpush1.bf16.msra.mxu1 %v976_v13  ;;  %v948_v22 = vpack.c.bf16 %v283_v20, %v279_v19  ;;  %v292_v25 = vld [vmem:[#allocation6 + $0xa8] sm:$0xff]  ;;  %947 = vmatprep.subr.bf16.mxu0 %v946_v17  ;;  %v980_v26 = vpack.c.bf16 %v285_v23, %v281_v21  ;;  %v290_v28 = vld [vmem:[#allocation6 + $0x98] sm:$0xff]  ;;  %v287_v30 = vld [vmem:[#allocation6 + $0x80] sm:$0xff]  ;;  %s1242_s17 = scalar_lea.vmem %s1241_s15, 256  ;;  %p1243_p5 = scmp.lt.s32.totalorder %s1547_s7, %s1241_s15 }
  0x71   : > { %979 = vmatprep.subr.bf16.mxu1 %v978_v18  ;;  %v950_v27 = vpack.c.bf16 %v292_v25, %v288_v24  ;;  %v294_v29 = vld [vmem:[#allocation6 + $0xb8] sm:$0xff]  ;;  %v291_v32 = vld [vmem:[#allocation6 + $0xa0] sm:$0xff]  ;;  %v289_v33 = vld [vmem:[#allocation6 + $0x90] sm:$0xff]  ;;  %p1239_p3 = pneg %p1238_p1  ;;  %p1244_p9 = scmp.lt.s32.totalorder %s1242_s17, %s1236_s11 }
  0x72   : > { %v982_v31 = vpack.c.bf16 %v294_v29, %v290_v28  ;;  %v293_v34 = vld [vmem:[#allocation6 + $0xb0] sm:$0xff]  ;;  %v952_v35 = vpack.c.bf16 %v291_v32, %v287_v30  ;;  %v296_v36 = vld [vmem:[#allocation6 + $0xc8] sm:$0xff]  ;;  %v298_v38 = vld [vmem:[#allocation6 + $0xd8] sm:$0xff] }
  0x73   : > { %949 = vmatpush1.bf16.msra.mxu0 %v948_v22  ;;  %v300_v37 = vld [vmem:[#allocation6 + $0xe8] sm:$0xff]  ;;  %v984_v39 = vpack.c.bf16 %v293_v34, %v289_v33  ;;  %v302_v41 = vld [vmem:[#allocation6 + $0xf8] sm:$0xff]  ;;  %v295_v42 = vld [vmem:[#allocation6 + $0xc0] sm:$0xff]  ;;  %p1245_p12 = por %p1244_p9, %p1243_p5 }
  0x74   : > { %981 = vmatpush1.bf16.msra.mxu1 %v980_v26  ;;  %951 = vmatprep.subr.bf16.mxu0 %v950_v27  ;;  %v954_v40 = vpack.c.bf16 %v300_v37, %v296_v36  ;;  %v299_v43 = vld [vmem:[#allocation6 + $0xe0] sm:$0xff]  ;;  %v986_v44 = vpack.c.bf16 %v302_v41, %v298_v38  ;;  %v297_v45 = vld [vmem:[#allocation6 + $0xd0] sm:$0xff]  ;;  %v304_v47 = vld [vmem:[#allocation6 + $0x108] sm:$0xff] }
  0x75   : > { %983 = vmatprep.subr.bf16.mxu1 %v982_v31  ;;  %v301_v46 = vld [vmem:[#allocation6 + $0xf0] sm:$0xff]  ;;  %v308_v48 = vld [vmem:[#allocation6 + $0x128] sm:$0xff]  ;;  %v306_v49 = vld [vmem:[#allocation6 + $0x118] sm:$0xff]  ;;  %v956_v51 = vpack.c.bf16 %v299_v43, %v295_v42  ;;  %p1246_p2 = pnand %p1245_p12, %p1239_p3 }
  0x76   : > { %v310_v50 = vld [vmem:[#allocation6 + $0x138] sm:$0xff]  ;;  %v988_v52 = vpack.c.bf16 %v301_v46, %v297_v45  ;;  %v958_v53 = vpack.c.bf16 %v308_v48, %v304_v47  ;;  %v303_v54 = vld [vmem:[#allocation6 + $0x100] sm:$0xff]  ;;  %v305_v56 = vld [vmem:[#allocation6 + $0x110] sm:$0xff] }
  0x77   : > { %953 = vmatpush1.bf16.msra.mxu0 %v952_v35  ;;  %v307_v55 = vld [vmem:[#allocation6 + $0x120] sm:$0xff]  ;;  %v990_v57 = vpack.c.bf16 %v310_v50, %v306_v49  ;;  %v309_v58 = vld [vmem:[#allocation6 + $0x130] sm:$0xff]  ;;  %v312_v59 = vld [vmem:[#allocation6 + $0x148] sm:$0xff] }
  0x78   : > { %985 = vmatpush1.bf16.msra.mxu1 %v984_v39  ;;  %955 = vmatprep.subr.bf16.mxu0 %v954_v40  ;;  %v316_v60 = vld [vmem:[#allocation6 + $0x168] sm:$0xff]  ;;  %v314_v61 = vld [vmem:[#allocation6 + $0x158] sm:$0xff]  ;;  %v960_v63 = vpack.c.bf16 %v307_v55, %v303_v54  ;;  %v992_v0 = vpack.c.bf16 %v309_v58, %v305_v56  ;;  %v311_v2 = vld [vmem:[#allocation6 + $0x140] sm:$0xff] }
  0x79   : > { %987 = vmatprep.subr.bf16.mxu1 %v986_v44  ;;  %v318_v62 = vld [vmem:[#allocation6 + $0x178] sm:$0xff]  ;;  %v962_v1 = vpack.c.bf16 %v316_v60, %v312_v59  ;;  %v315_v3 = vld [vmem:[#allocation6 + $0x160] sm:$0xff]  ;;  %v313_v4 = vld [vmem:[#allocation6 + $0x150] sm:$0xff] }
  0x7a   : > { %v994_v5 = vpack.c.bf16 %v318_v62, %v314_v61  ;;  %v317_v6 = vld [vmem:[#allocation6 + $0x170] sm:$0xff]  ;;  %v320_v7 = vld [vmem:[#allocation6 + $0x188] sm:$0xff]  ;;  %v322_v9 = vld [vmem:[#allocation6 + $0x198] sm:$0xff]  ;;  %v964_v11 = vpack.c.bf16 %v315_v3, %v311_v2 }
  0x7b   : > { %957 = vmatpush1.bf16.msra.mxu0 %v956_v51  ;;  %v324_v8 = vld [vmem:[#allocation6 + $0x1a8] sm:$0xff]  ;;  %v326_v10 = vld [vmem:[#allocation6 + $0x1b8] sm:$0xff]  ;;  %v996_v12 = vpack.c.bf16 %v317_v6, %v313_v4  ;;  %v319_v14 = vld [vmem:[#allocation6 + $0x180] sm:$0xff] }
  0x7c   : > { %989 = vmatpush1.bf16.msra.mxu1 %v988_v52  ;;  %959 = vmatprep.subr.bf16.mxu0 %v958_v53  ;;  %v966_v13 = vpack.c.bf16 %v324_v8, %v320_v7  ;;  %v323_v15 = vld [vmem:[#allocation6 + $0x1a0] sm:$0xff]  ;;  %v321_v16 = vld [vmem:[#allocation6 + $0x190] sm:$0xff]  ;;  %v998_v17 = vpack.c.bf16 %v326_v10, %v322_v9  ;;  %v328_v19 = vld [vmem:[#allocation6 + $0x1c8] sm:$0xff] }
  0x7d   : > { %991 = vmatprep.subr.bf16.mxu1 %v990_v57  ;;  %v325_v18 = vld [vmem:[#allocation6 + $0x1b0] sm:$0xff]  ;;  %v332_v20 = vld [vmem:[#allocation6 + $0x1e8] sm:$0xff]  ;;  %v330_v21 = vld [vmem:[#allocation6 + $0x1d8] sm:$0xff]  ;;  %v968_v23 = vpack.c.bf16 %v323_v15, %v319_v14 }
  0x7e   : > { %v334_v22 = vld [vmem:[#allocation6 + $0x1f8] sm:$0xff]  ;;  %v1000_v24 = vpack.c.bf16 %v325_v18, %v321_v16  ;;  %v970_v25 = vpack.c.bf16 %v332_v20, %v328_v19  ;;  %v327_v26 = vld [vmem:[#allocation6 + $0x1c0] sm:$0xff]  ;;  %v329_v28 = vld [vmem:[#allocation6 + $0x1d0] sm:$0xff] }
  0x7f   : > { %961 = vmatpush1.bf16.msra.mxu0 %v960_v63  ;;  %v331_v27 = vld [vmem:[#allocation6 + $0x1e0] sm:$0xff]  ;;  %v1002_v29 = vpack.c.bf16 %v334_v22, %v330_v21  ;;  %v333_v30 = vld [vmem:[#allocation6 + $0x1f0] sm:$0xff]  ;;  %v553_v32 = vld [vmem:[#allocation8 + $0x88] sm:$0xff] }
  0x80   : > { %993 = vmatpush1.bf16.msra.mxu1 %v992_v0  ;;  %963 = vmatprep.subr.bf16.mxu0 %v962_v1  ;;  %v552_v31 = vld [vmem:[#allocation8 + $0x80] sm:$0xff]  ;;  %v585_v34 = vld [vmem:[#allocation8 + $0x188] sm:$0xff]  ;;  %v972_v35 = vpack.c.bf16 %v331_v27, %v327_v26  ;;  %v1004_v36 = vpack.c.bf16 %v333_v30, %v329_v28  ;;  %v269_v43 = vld [vmem:[%s1522_s23] sm:$0xff] }
  0x81   : > { %995 = vmatprep.subr.bf16.mxu1 %v994_v5  ;;  %v584_v33 = vld [vmem:[#allocation8 + $0x180] sm:$0xff]  ;;  %v1006_v37 = vpack.c.bf16 %v553_v32, %v552_v31  ;;  %v537_v39 = vld [vmem:[#allocation8 + $0x8] sm:$0xff]  ;;  %v554_v46 = vld [vmem:[#allocation8 + $0x90] sm:$0xff] }
  0x82   : > { %v536_v38 = vld [vmem:[#allocation8] sm:$0xff]  ;;  %v1038_v40 = vpack.c.bf16 %v585_v34, %v584_v33  ;;  %v569_v42 = vld [vmem:[#allocation8 + $0x108] sm:$0xff]  ;;  %v555_v47 = vld [vmem:[#allocation8 + $0x98] sm:$0xff] }
  0x83   : > { %965 = vmatpush1.bf16.msra.mxu0 %v964_v11  ;;  %v568_v41 = vld [vmem:[#allocation8 + $0x100] sm:$0xff]  ;;  %v1008_v44 = vpack.c.bf16 %v537_v39, %v536_v38  ;;  %v586_v48 = vld [vmem:[#allocation8 + $0x190] sm:$0xff]  ;;  %v1010_v49 = vpack.c.bf16 %v555_v47, %v554_v46  ;;  %v587_v50 = vld [vmem:[#allocation8 + $0x198] sm:$0xff] }
  0x84   : > { %997 = vmatpush1.bf16.msra.mxu1 %v996_v12  ;;  %967 = vmatprep.subr.bf16.mxu0 %v966_v13  ;;  %v1040_v45 = vpack.c.bf16 %v569_v42, %v568_v41  ;;  %v538_v51 = vld [vmem:[#allocation8 + $0x10] sm:$0xff]  ;;  %v539_v52 = vld [vmem:[#allocation8 + $0x18] sm:$0xff]  ;;  %v1042_v53 = vpack.c.bf16 %v587_v50, %v586_v48  ;;  %v556_v58 = vld [vmem:[#allocation8 + $0xa0] sm:$0xff] }
  0x85   : > { %999 = vmatprep.subr.bf16.mxu1 %v998_v17  ;;  %v1012_v54 = vpack.c.bf16 %v539_v52, %v538_v51  ;;  %v570_v55 = vld [vmem:[#allocation8 + $0x110] sm:$0xff]  ;;  %v571_v56 = vld [vmem:[#allocation8 + $0x118] sm:$0xff]  ;;  %v557_v59 = vld [vmem:[#allocation8 + $0xa8] sm:$0xff] }
  0x86   : > { %v1044_v57 = vpack.c.bf16 %v571_v56, %v570_v55  ;;  %v588_v60 = vld [vmem:[#allocation8 + $0x1a0] sm:$0xff]  ;;  %v1014_v61 = vpack.c.bf16 %v557_v59, %v556_v58  ;;  %v589_v62 = vld [vmem:[#allocation8 + $0x1a8] sm:$0xff]  ;;  %v558_v6 = vld [vmem:[#allocation8 + $0xb0] sm:$0xff] }
  0x87   : > { %969 = vmatpush1.bf16.msra.mxu0 %v968_v23  ;;  %v540_v63 = vld [vmem:[#allocation8 + $0x20] sm:$0xff]  ;;  %v541_v0 = vld [vmem:[#allocation8 + $0x28] sm:$0xff]  ;;  %v1046_v1 = vpack.c.bf16 %v589_v62, %v588_v60  ;;  %v559_v7 = vld [vmem:[#allocation8 + $0xb8] sm:$0xff] }
  0x88   : > { %1001 = vmatpush1.bf16.msra.mxu1 %v1000_v24  ;;  %971 = vmatprep.subr.bf16.mxu0 %v970_v25  ;;  %v1016_v2 = vpack.c.bf16 %v541_v0, %v540_v63  ;;  %v572_v3 = vld [vmem:[#allocation8 + $0x120] sm:$0xff]  ;;  %v573_v4 = vld [vmem:[#allocation8 + $0x128] sm:$0xff]  ;;  %v590_v8 = vld [vmem:[#allocation8 + $0x1b0] sm:$0xff]  ;;  %v1018_v9 = vpack.c.bf16 %v559_v7, %v558_v6 }
  0x89   : > { %1003 = vmatprep.subr.bf16.mxu1 %v1002_v29  ;;  %v1048_v5 = vpack.c.bf16 %v573_v4, %v572_v3  ;;  %v591_v10 = vld [vmem:[#allocation8 + $0x1b8] sm:$0xff]  ;;  %v542_v11 = vld [vmem:[#allocation8 + $0x30] sm:$0xff]  ;;  %v560_v18 = vld [vmem:[#allocation8 + $0xc0] sm:$0xff] }
  0x8a   : > { %v543_v12 = vld [vmem:[#allocation8 + $0x38] sm:$0xff]  ;;  %v1050_v13 = vpack.c.bf16 %v591_v10, %v590_v8  ;;  %v574_v15 = vld [vmem:[#allocation8 + $0x130] sm:$0xff]  ;;  %v561_v19 = vld [vmem:[#allocation8 + $0xc8] sm:$0xff] }
  0x8b   : > { %973 = vmatpush1.bf16.msra.mxu0 %v972_v35  ;;  %v1020_v14 = vpack.c.bf16 %v543_v12, %v542_v11  ;;  %v575_v16 = vld [vmem:[#allocation8 + $0x138] sm:$0xff]  ;;  %v592_v20 = vld [vmem:[#allocation8 + $0x1c0] sm:$0xff]  ;;  %v1022_v21 = vpack.c.bf16 %v561_v19, %v560_v18  ;;  %v593_v22 = vld [vmem:[#allocation8 + $0x1c8] sm:$0xff] }
  0x8c   : > { %1005 = vmatpush1.bf16.msra.mxu1 %v1004_v36  ;;  %1007 = vmatprep.subr.bf16.mxu0 %v1006_v37  ;;  %v1052_v17 = vpack.c.bf16 %v575_v16, %v574_v15  ;;  %v544_v23 = vld [vmem:[#allocation8 + $0x40] sm:$0xff]  ;;  %v545_v24 = vld [vmem:[#allocation8 + $0x48] sm:$0xff]  ;;  %v1054_v25 = vpack.c.bf16 %v593_v22, %v592_v20  ;;  %v562_v30 = vld [vmem:[#allocation8 + $0xd0] sm:$0xff] }
  0x8d   : > { %1039 = vmatprep.subr.bf16.mxu1 %v1038_v40  ;;  %v1024_v26 = vpack.c.bf16 %v545_v24, %v544_v23  ;;  %v576_v27 = vld [vmem:[#allocation8 + $0x140] sm:$0xff]  ;;  %v577_v28 = vld [vmem:[#allocation8 + $0x148] sm:$0xff]  ;;  %v563_v31 = vld [vmem:[#allocation8 + $0xd8] sm:$0xff] }
  0x8e   : > { %422 = vmatmul.mubr.f32.vlgmr.msra.gmra.mrb[0].mxu0 %v269_v43  ;;  %v1056_v29 = vpack.c.bf16 %v577_v28, %v576_v27  ;;  %v594_v32 = vld [vmem:[#allocation8 + $0x1d0] sm:$0xff]  ;;  %v1026_v33 = vpack.c.bf16 %v563_v31, %v562_v30  ;;  %v595_v34 = vld [vmem:[#allocation8 + $0x1d8] sm:$0xff]  ;;  %v564_v42 = vld [vmem:[#allocation8 + $0xe0] sm:$0xff] }
  0x8f   : > { %493 = vmatmul.mubr.f32.vlgmr.msra.gmra.mrb[0].mxu1 %v269_v43  ;;  %1009 = vmatpush3.bf16.msra.mxu0 %v1008_v44  ;;  %v546_v35 = vld [vmem:[#allocation8 + $0x50] sm:$0xff]  ;;  %v547_v36 = vld [vmem:[#allocation8 + $0x58] sm:$0xff]  ;;  %v1058_v37 = vpack.c.bf16 %v595_v34, %v594_v32  ;;  %v565_v43 = vld [vmem:[#allocation8 + $0xe8] sm:$0xff] }
  0x90   : > { %1041 = vmatpush3.bf16.msra.mxu1 %v1040_v45  ;;  %1011 = vmatprep.subr.bf16.mxu0 %v1010_v49  ;;  %v1028_v38 = vpack.c.bf16 %v547_v36, %v546_v35  ;;  %v578_v39 = vld [vmem:[#allocation8 + $0x150] sm:$0xff]  ;;  %v579_v40 = vld [vmem:[#allocation8 + $0x158] sm:$0xff]  ;;  %v596_v44 = vld [vmem:[#allocation8 + $0x1e0] sm:$0xff]  ;;  %v1030_v45 = vpack.c.bf16 %v565_v43, %v564_v42 }
  0x91   : > { %1043 = vmatprep.subr.bf16.mxu1 %v1042_v53  ;;  %v1060_v41 = vpack.c.bf16 %v579_v40, %v578_v39  ;;  %v597_v46 = vld [vmem:[#allocation8 + $0x1e8] sm:$0xff]  ;;  %v548_v47 = vld [vmem:[#allocation8 + $0x60] sm:$0xff]  ;;  %v567_v55 = vld [vmem:[#allocation8 + $0xf8] sm:$0xff] }
  0x92   : > { %v549_v48 = vld [vmem:[#allocation8 + $0x68] sm:$0xff]  ;;  %v1062_v49 = vpack.c.bf16 %v597_v46, %v596_v44  ;;  %v580_v51 = vld [vmem:[#allocation8 + $0x160] sm:$0xff]  ;;  %v598_v56 = vld [vmem:[#allocation8 + $0x1f0] sm:$0xff] }
  0x93   : > { %1013 = vmatpush3.bf16.msra.mxu0 %v1012_v54  ;;  %v1032_v50 = vpack.c.bf16 %v549_v48, %v548_v47  ;;  %v581_v52 = vld [vmem:[#allocation8 + $0x168] sm:$0xff]  ;;  %v566_v54 = vld [vmem:[#allocation8 + $0xf0] sm:$0xff]  ;;  %v599_v58 = vld [vmem:[#allocation8 + $0x1f8] sm:$0xff] }
  0x94   : > { %1045 = vmatpush3.bf16.msra.mxu1 %v1044_v57  ;;  %1015 = vmatprep.subr.bf16.mxu0 %v1014_v61  ;;  %v1064_v53 = vpack.c.bf16 %v581_v52, %v580_v51  ;;  %v1034_v57 = vpack.c.bf16 %v567_v55, %v566_v54  ;;  %v550_v59 = vld [vmem:[#allocation8 + $0x70] sm:$0xff]  ;;  %v551_v60 = vld [vmem:[#allocation8 + $0x78] sm:$0xff]  ;;  %v1066_v61 = vpack.c.bf16 %v599_v58, %v598_v56 }
  0x95   : > { %1047 = vmatprep.subr.bf16.mxu1 %v1046_v1  ;;  %v1036_v62 = vpack.c.bf16 %v551_v60, %v550_v59  ;;  %v582_v63 = vld [vmem:[#allocation8 + $0x170] sm:$0xff]  ;;  %v583_v0 = vld [vmem:[#allocation8 + $0x178] sm:$0xff] }
  0x96   : > { %v1068_v1 = vpack.c.bf16 %v583_v0, %v582_v63  ;;  %v867_v63 = vld [vmem:[%s1593_s4] ss:$0 sm:$0xff] }
  0x97   : > { %1017 = vmatpush3.bf16.msra.mxu0 %v1016_v2  ;;  %v337_v2 = vlaneseq }
  0x98   : > { %1049 = vmatpush3.bf16.msra.mxu1 %v1048_v5  ;;  %1019 = vmatprep.subr.bf16.mxu0 %v1018_v9  ;;  %v335_v5 = vld [vmem:[%s1591_s2] sm:$0xf] }
  0x99   : > { %1051 = vmatprep.subr.bf16.mxu1 %v1050_v13  ;;  %v338_v3 = vshrl.u32 %v337_v2, 7 }
  0x9b   : > { %1021 = vmatpush3.bf16.msra.mxu0 %v1020_v14  ;;  %v339_v4 = vsub.s32 0, %v338_v3  ;;  %v347_v6 = vsub.s32 2, %v338_v3  ;;  %v343_v7 = vsub.s32 1, %v338_v3  ;;  %v351_v8 = vsub.s32 3, %v338_v3 }
  0x9c   : > { %1053 = vmatpush3.bf16.msra.mxu1 %v1052_v17  ;;  %1023 = vmatprep.subr.bf16.mxu0 %v1022_v21 }
  0x9d   : > { %1055 = vmatprep.subr.bf16.mxu1 %v1054_v25  ;;  %v340_v9 = vrot.slane %v335_v5, %v339_v4  ;;  %v348_v10 = vrot.slane %v335_v5, %v347_v6  ;;  %v344_v11 = vrot.slane %v335_v5, %v343_v7  ;;  %v352_v12 = vrot.slane %v335_v5, %v351_v8 }
  0x9f   : > { %1025 = vmatpush3.bf16.msra.mxu0 %v1024_v26 }
  0xa0   : > { %1057 = vmatpush3.bf16.msra.mxu1 %v1056_v29  ;;  %1027 = vmatprep.subr.bf16.mxu0 %v1026_v33 }
  0xa1   : > { %1059 = vmatprep.subr.bf16.mxu1 %v1058_v37 }
  0xa3   : > { %1029 = vmatpush3.bf16.msra.mxu0 %v1028_v38 }
  0xa4   : > { %1061 = vmatpush3.bf16.msra.mxu1 %v1060_v41  ;;  %1031 = vmatprep.subr.bf16.mxu0 %v1030_v45 }
  0xa5   : > { %1063 = vmatprep.subr.bf16.mxu1 %v1062_v49 }
  0xa7   : > { %1033 = vmatpush3.bf16.msra.mxu0 %v1032_v50 }
  0xa8   : > { %1065 = vmatpush3.bf16.msra.mxu1 %v1064_v53  ;;  %1035 = vmatprep.subr.bf16.mxu0 %v1034_v57 }
  0xa9   : > { %1067 = vmatprep.subr.bf16.mxu1 %v1066_v61 }
  0xab   : > { %1037 = vmatpush3.bf16.msra.mxu0 %v1036_v62 }
  0xac   : > { %1069 = vmatpush3.bf16.msra.mxu1 %v1068_v1 }
 0x161   : > { %v423_v13 = vpop.f32.mrb[0].mxu0 }
 0x162   : > { %v424_v14 = vadd.f32 %v423_v13, %v340_v9  ;;  %v494_v15 = vpop.f32.mrb[0].mxu1  ;;  %v425_v16 = vpop.f32.mrb[1].mxu0 }
 0x163   : > { %v495_v17 = vadd.f32 %v494_v15, %v348_v10  ;;  %v426_v18 = vadd.f32 %v425_v16, %v344_v11  ;;  %v496_v19 = vpop.f32.mrb[1].mxu1 }
 0x164   : > { %v499_v20 = vmul.f32 %v424_v14, %v424_v14  ;;  %v497_v21 = vadd.f32 %v496_v19, %v352_v12  ;;  %v503_v49 = vmul.f32 0.5, %v424_v14 }
 0x165   : > { %v501_v22 = vmul.f32 %v495_v17, %v495_v17  ;;  %v500_v23 = vmul.f32 %v426_v18, %v426_v18  ;;  %v504_v47 = vmul.f32 0.5, %v426_v18  ;;  %v505_v52 = vmul.f32 0.5, %v495_v17 }
 0x166   : > { %v507_v24 = vmul.f32 0.044715, %v499_v20  ;;  %v502_v25 = vmul.f32 %v497_v21, %v497_v21  ;;  %v506_v50 = vmul.f32 0.5, %v497_v21 }
 0x167   : > { %v509_v26 = vmul.f32 0.044715, %v501_v22  ;;  %v508_v27 = vmul.f32 0.044715, %v500_v23 }
 0x168   : > { %v511_v28 = vadd.f32 1.0, %v507_v24  ;;  %v510_v29 = vmul.f32 0.044715, %v502_v25 }
 0x169   : > { %v513_v30 = vadd.f32 1.0, %v509_v26  ;;  %v512_v31 = vadd.f32 1.0, %v508_v27 }
 0x16a   : > { %v515_v32 = vmul.f32 %v511_v28, %v424_v14  ;;  %v514_v33 = vadd.f32 1.0, %v510_v29 }
 0x16b   : > { %v517_v34 = vmul.f32 %v513_v30, %v495_v17  ;;  %v516_v35 = vmul.f32 %v512_v31, %v426_v18 }
 0x16c   : > { %v519_v36 = vmul.f32 0.7978846, %v515_v32  ;;  %v518_v37 = vmul.f32 %v514_v33, %v497_v21 }
 0x16d   : > { %v521_v38 = vmul.f32 0.7978846, %v517_v34  ;;  %v520_v39 = vmul.f32 0.7978846, %v516_v35 }
 0x16e   : > { %1142 = vtanh.f32 %v519_v36  ;;  %v522_v40 = vmul.f32 0.7978846, %v518_v37 }
 0x16f   : > { %1144 = vtanh.f32 %v521_v38 }
 0x170   : > { %1146 = vtanh.f32 %v520_v39 }
 0x171   : > { %1148 = vtanh.f32 %v522_v40 }
 0x178   : > { %v1143_v41 = vpop.eup %1142 }
 0x179   : > { %v1145_v42 = vpop.eup %1144  ;;  %v527_v44 = vadd.f32 1.0, %v1143_v41 }
 0x17a   : > { %v1147_v43 = vpop.eup %1146  ;;  %v529_v46 = vadd.f32 1.0, %v1145_v42 }
 0x17b   : > { %v1149_v45 = vpop.eup %1148  ;;  %v528_v48 = vadd.f32 1.0, %v1147_v43  ;;  %v531_v54 = vmul.f32 %v527_v44, %v503_v49 }
 0x17c   : > { %v530_v51 = vadd.f32 1.0, %v1149_v45  ;;  %v533_v56 = vmul.f32 %v529_v46, %v505_v52 }
 0x17d   : > { %v532_v53 = vmul.f32 %v528_v48, %v504_v47 }
 0x17e   : > { %v534_v55 = vmul.f32 %v530_v51, %v506_v50 }
 0x17f   : > { %664 = vmatprep.mubr.f32.mxu0 %v532_v53 }
 0x180   : > { %734 = vmatprep.mubr.f32.mxu1 %v534_v55  ;;  %665 = vmatmul.mubr.f32.vlgmr.msra.gmra.mrb[2].mxu0 %v531_v54 }
 0x181   : > { %735 = vmatmul.mubr.f32.vlgmr.msra.gmra.mrb[2].mxu1 %v533_v56 }
 0x253   : > { %v904_v57 = vpop.f32.mrb[2].mxu0 }
 0x254   : > { %v939_v58 = vpop.f32.mrb[2].mxu1  ;;  %v905_v59 = vpop.f32.mrb[3].mxu0 }
 0x255   : > { %v906_v60 = vadd.f32 %v905_v59, %v904_v57  ;;  %v940_v61 = vpop.f32.mrb[3].mxu1 }
 0x256   : > { %v941_v62 = vadd.f32 %v940_v61, %v939_v58 }
 0x258   : > { %v737_v0 = vadd.f32 %v941_v62, %v906_v60 }
 0x25a   : > { %v750_v1 = vadd.f32 %v867_v63, %v737_v0 }
 0x25c   : > { %751 = vst [vmem:[%s268_s13] sm:$0xff] %v750_v1 }
 0x25d   : > { %1249 = shalt.err (!%p1246_p2)
}
 0x25e   : > { %s1250_s14 = scalar_lea.hbm %s1545_s8, 128  ;;  %s1254_s26 = scalar_lea.hbm %s1594_s5, 256 }
 0x25f   : > { %p1251_p13 = scmp.ne.s32.totalorder %s1545_s8, %s1250_s14  ;;  %p1255_p4 = scmp.lt.u32.totalorder %s1545_s8, %s1594_s5 }
 0x260   : > { %p1256_p7 = scmp.lt.u32.totalorder %s1254_s26, %s1250_s14  ;;  %p1258_p11 = scmp.lt.u32.totalorder %s1250_s14, %s1545_s8 }
 0x261   : > { %p1252_p6 = pnand %p1251_p13, %p1608_p0 }
 0x262   : > { %p1257_p8 = por %p1256_p7, %p1255_p4 }
 0x263   : > { %p1253_p10 = pneg %p1252_p6 }
 0x264   : > { %p1259_p1 = por %p1258_p11, %p1257_p8 }
 0x266   : > { %p1260_p3 = pnand %p1259_p1, %p1253_p10 }
 0x268   : > { %1263 = shalt.err (!%p1260_p3)
}
 0x269   : > { %1080 = dma.vmem_to_hbm [thread:$0]  (%p1608_p0), %s1547_s7, 128, %s1545_s8, %s753_s9  }
 0x26a PF: > { %s778_s12 = sand.u32 1, %s1294_s18   ;;  %p1609_p5 = scmp.ne.s32.totalorder %s1599_s25, 0 }
 0x26b   : > { %p1610_p9 = scmp.ge.s32.totalorder %s1306_s21, 2  ;;  %s779_s13 = scalar_lea.sflag [#allocation5], %s778_s12 }
 0x26d   : > { %p1094_p12 = pnand %p1610_p9, %p1609_p5 }
 0x26f   : > { %1289 = dma.done.wait (!%p1094_p12), %s779_s13, 128  }
 0x270   : > { %1291 = vsyncadd (!%p1094_p12), %s779_s13, 4294967168  ;;  %p19_p2 = scmp.ge.s32.totalorder %s1457_s16, 4   ;;  %s1611_s18 = smov %s1298_s19 }
 0x271   : > { %s1612_s19 = smov %s1302_s20  ;;  %s1613_s20 = smov %s1466_s27 }
 0x272   : > { %s1614_s21 = smov %s1457_s16  ;;  %21 = sbr.rel (!%p19_p2) target bundleno = 6 (0x6), region = 93 }
 0x279   :  { %784 = vsyncpa [#allocation4], 1 }
 0x27a   :  { %786 = vsyncpa [#allocation4 + $0x1], 1 }
 0x27b   :  { %787 = vsyncpa [#allocation7], 1 }
 0x27c   :  { %788 = vsyncpa [#allocation5], 1 }
 0x27d   :  { %790 = vsyncpa [#allocation5 + $0x1], 1 }

// kernel: tpu_custom_call.1
= control target key start
LH: loop header
LB: loop body
LE: loop exit
PB: predicated region body
PF: predicated region fallthrough
CT: control target
= control target key end

     0   :  { %10 = vsyncpa [#allocation4], 0  ;;  %s1589_s0 = inlined_call_operand.hbm [shape: f32[16,128], index: 0, kind: input, shape index: {}]   ;;  %s1590_s1 = inlined_call_operand.hbm [shape: f32[128,512], index: 1, kind: input, shape index: {}]   ;;  %s1591_s2 = inlined_call_operand.vmem [shape: f32[1,512], index: 2, kind: input, shape index: {}]   ;;  %s1592_s3 = inlined_call_operand.hbm [shape: f32[512,128], index: 3, kind: input, shape index: {}]   ;;  %s1593_s4 = inlined_call_operand.vmem [shape: f32[1,128], index: 4, kind: input, shape index: {}]   ;;  %s1594_s5 = inlined_call_operand.hbm [shape: f32[16,128], index: 5, kind: output, shape index: {}]  }
   0x1   :  { %12 = vsyncpa [#allocation4 + $0x1], 0 }
   0x2   :  { %13 = vsyncpa [#allocation7], 0 }
   0x3   :  { %14 = vsyncpa [#allocation5], 0 }
   0x4   :  { %16 = vsyncpa [#allocation5 + $0x1], 0  ;;  %s1347_s18 = smov 0   ;;  %s1349_s19 = smov 0  }
   0x5   :  { %s1351_s20 = smov 0   ;;  %s1353_s21 = smov 0  }
   0x6 LB: > { %s1368_s22 = sadd.s32 4294967295, %s1306_s21   ;;  %s855_s23 = sadd.s32 4294967294, %s1306_s21   ;;  %s1306_s21 = sphi %s1353_s21, %s1614_s21   ;;  %s1302_s20 = sphi %s1351_s20, %s1613_s20   ;;  %s1298_s19 = sphi %s1349_s19, %s1612_s19   ;;  %s1294_s18 = sphi %s1347_s18, %s1611_s18  }
   0x7   : > { %p42_p0 = scmp.ne.s32.totalorder %s1298_s19, %s1294_s18  ;;  %p1595_p1 = scmp.eq.s32.totalorder %s1368_s22, 0 }
   0x8   : > { %p156_p3 = scmp.eq.s32.totalorder %s855_s23, 1  ;;  %p856_p5 = scmp.ge.s32.totalorder %s1306_s21, 1 }
   0x9   : > { %p1377_p4 = por %p1595_p1, %p42_p0  ;;  %p163_p7 = scmp.lt.s32.totalorder %s1306_s21, 3 }
   0xa   : > { %p1382_p6 = por %p156_p3, %p42_p0  ;;  %s1308_s27 = smov [#allocation6]  }
   0xb   : > { %s1598_s24 = scalar_select %p1377_p4, 1, 0 }
   0xc   : > { %s1599_s25 = scalar_select %p1382_p6, 1, 0 }
   0xd   : > { %p1387_p8 = pnand %p856_p5, %p163_p7  ;;  %s175_s28 = sshll.u32 %s1308_s27, 4  ;;  %s1391_s28 = int_to_ptr.vmem [resolvable:$true] %s175_s28 }
   0xe   : > { %s1309_s30 = smov [#allocation8]   ;;  %s1150_s9 = scalar_lea.hbm %s1590_s1, 8192 }
   0xf   : > { %p1082_p9 = pneg %p1387_p8  ;;  %s191_s6 = sshll.u32 %s1309_s30, 4  ;;  %s1402_s6 = int_to_ptr.vmem [resolvable:$true] %s191_s6 }
  0x10   : > { %p1151_p12 = scmp.ne.s32.totalorder %s1590_s1, %s1150_s9  ;;  %p1157_p5 = scmp.lt.u32.totalorder %s1150_s9, %s1590_s1 }
  0x11   : > { %p1398_p11 = pnand %p1082_p9, %p1595_p1 }
  0x13   : > { %p1152_p13 = pneg %p1398_p11 }
  0x15   : > { %p1153_p0 = pnand %p1152_p13, %p1151_p12 }
  0x17   : > { %p1154_p3 = pneg %p1153_p0 }
  0x19   : > { %p1159_p7 = pnand %p1157_p5, %p1154_p3 }
  0x1b   : > { %1162 = shalt.err (!%p1159_p7)
}
  0x1c   : > { %s1163_s14 = scalar_lea.vmem %s1391_s28, 8192  ;;  %p1171_p2 = scmp.lt.s32.totalorder %s1391_s28, %s1391_s28 }
  0x1d   : > { %p1164_p9 = scmp.ne.s32.totalorder %s1391_s28, %s1163_s14  ;;  %p1172_p12 = scmp.lt.s32.totalorder %s1163_s14, %s1163_s14 }
  0x1f   : > { %p1166_p10 = pnand %p1164_p9, %p1152_p13  ;;  %p1173_p0 = por %p1172_p12, %p1171_p2 }
  0x21   : > { %p1167_p1 = pneg %p1166_p10 }
  0x23   : > { %p1174_p6 = pnand %p1173_p0, %p1167_p1 }
  0x25   : > { %1177 = shalt.err (!%p1174_p6)
}
  0x26   : > { %s1310_s15 = smov 512   ;;  %s1311_s16 = smov 32  }
  0x27   : > { %1085 = dma.hbm_to_vmem [thread:$0]  (!%p1398_p11), %s1590_s1, 8192, %s1391_s28, [#allocation7], %s1310_s15, %s1310_s15, %s1311_s16  }
  0x28   : > { %s1178_s7 = scalar_lea.hbm %s1592_s3, 8192 }
  0x29   : > { %p1179_p2 = scmp.ne.s32.totalorder %s1592_s3, %s1178_s7  ;;  %p1185_p10 = scmp.lt.u32.totalorder %s1178_s7, %s1592_s3 }
  0x2b   : > { %p1181_p1 = pnand %p1179_p2, %p1152_p13 }
  0x2d   : > { %p1182_p6 = pneg %p1181_p1 }
  0x2f   : > { %p1187_p3 = pnand %p1185_p10, %p1182_p6 }
  0x31   : > { %1190 = shalt.err (!%p1187_p3)
}
  0x32   : > { %s1191_s28 = scalar_lea.vmem %s1402_s6, 8192  ;;  %p1199_p12 = scmp.lt.s32.totalorder %s1402_s6, %s1402_s6 }
  0x33   : > { %p1192_p5 = scmp.ne.s32.totalorder %s1402_s6, %s1191_s28  ;;  %p1200_p0 = scmp.lt.s32.totalorder %s1191_s28, %s1191_s28 }
  0x35   : > { %p1194_p7 = pnand %p1192_p5, %p1152_p13  ;;  %p1201_p2 = por %p1200_p0, %p1199_p12 }
  0x37   : > { %p1195_p9 = pneg %p1194_p7 }
  0x39   : > { %p1202_p1 = pnand %p1201_p2, %p1195_p9 }
  0x3b   : > { %1205 = shalt.err (!%p1202_p1)
}
  0x3c   : > { %s1312_s12 = smov 128   ;;  %s1313_s13 = smov 8  }
  0x3d   : > { %1088 = dma.hbm_to_vmem [thread:$0]  (!%p1398_p11), %s1592_s3, 8192, %s1402_s6, [#allocation7], %s1312_s12, %s1312_s12, %s1313_s13  }
  0x3e   : > { %s1457_s16 = sadd.s32 1, %s1306_s21   ;;  %s29_s23 = sadd.s32 1, %s1302_s20 }
  0x3f   : > { %s26_s17 = ssub.s32 %s1306_s21, %s1457_s16  ;;  %p36_p6 = scmp.ne.s32.totalorder %s1302_s20, %s1298_s19 }
  0x40   : > { %p27_p13 = scmp.eq.s32.totalorder %s26_s17, 0  ;;  %p37_p10 = scmp.eq.s32.totalorder %s1306_s21, 0 }
  0x41   : > { %p1602_p5 = scmp.eq.s32.totalorder %s1368_s22, 1  ;;  %p1099_p9 = scmp.lt.s32.totalorder %s1306_s21, 2 }
  0x42   : > { %s1466_s27 = scalar_select %p27_p13, %s1302_s20, %s29_s23  }
  0x43   : > { %p38_p3 = por %p37_p10, %p36_p6  ;;  %p1470_p7 = por %p1602_p5, %p36_p6 }
  0x44   : > { %s208_s29 = sand.u32 1, %s1302_s20   ;;  %s861_s6 = sshll.u32 %s1306_s21, 7 }
  0x45   : > { %s1603_s30 = scalar_select %p1470_p7, 1, 0 }
  0x46   : > { %s860_s7 = sshll.u32 %s208_s29, 3  ;;  %s1480_s10 = scalar_lea.hbm %s1589_s0, %s861_s6 }
  0x47   : > { %s212_s11 = scalar_lea.vmem [#allocation3], %s860_s7  ;;  %p1484_p11 = pnand %p1099_p9, %p38_p3 }
  0x48   : > { %s219_s28 = sshll.u32 %s212_s11, 4  ;;  %s209_s13 = scalar_lea.sflag [#allocation4], %s208_s29  ;;  %s1482_s28 = int_to_ptr.vmem [resolvable:$true] %s219_s28 }
  0x49   : > { %s1206_s14 = scalar_lea.hbm %s1480_s10, 128  ;;  %p1208_p0 = pneg %p1484_p11 }
  0x4a   : > { %p1207_p12 = scmp.ne.s32.totalorder %s1480_s10, %s1206_s14  ;;  %s1211_s23 = scalar_lea.hbm %s1589_s0, 256 }
  0x4b   : > { %p1212_p13 = scmp.lt.u32.totalorder %s1480_s10, %s1589_s0  ;;  %p1213_p6 = scmp.lt.u32.totalorder %s1211_s23, %s1206_s14 }
  0x4c   : > { %p1209_p2 = pnand %p1208_p0, %p1207_p12  ;;  %p1215_p3 = scmp.lt.u32.totalorder %s1206_s14, %s1480_s10 }
  0x4d   : > { %p1214_p10 = por %p1213_p6, %p1212_p13 }
  0x4e   : > { %p1210_p1 = pneg %p1209_p2 }
  0x4f   : > { %p1216_p5 = por %p1215_p3, %p1214_p10 }
  0x51   : > { %p1217_p9 = pnand %p1216_p5, %p1210_p1 }
  0x53   : > { %1220 = shalt.err (!%p1217_p9)
}
  0x54   : > { %s1221_s29 = scalar_lea.vmem %s1482_s28, 128  ;;  %s1314_s8 = smov [#allocation3]  }
  0x55   : > { %p1222_p12 = scmp.ne.s32.totalorder %s1482_s28, %s1221_s29  ;;  %s1226_s9 = sshll.u32 %s1314_s8, 4  ;;  %s1227_s9 = int_to_ptr.vmem [resolvable:$false] %s1226_s9 }
  0x56   : > { %s1228_s11 = scalar_lea.vmem %s1227_s9, 256  ;;  %p1229_p4 = scmp.lt.s32.totalorder %s1482_s28, %s1227_s9 }
  0x57   : > { %p1224_p2 = pnand %p1222_p12, %p1208_p0  ;;  %p1230_p13 = scmp.lt.s32.totalorder %s1228_s11, %s1221_s29 }
  0x59   : > { %p1225_p7 = pneg %p1224_p2  ;;  %p1231_p6 = por %p1230_p13, %p1229_p4 }
  0x5b   : > { %p1232_p10 = pnand %p1231_p6, %p1225_p7 }
  0x5d   : > { %1235 = shalt.err (!%p1232_p10)
}
  0x5e   : > { %1092 = dma.hbm_to_vmem [thread:$0]  (!%p1484_p11), %s1480_s10, 128, %s1482_s28, %s209_s13  }
  0x5f   : > { %228 = sbr.rel (%p1387_p8) target bundleno = 618 (0x26a), region = 40  ;;  %s1516_s14 = sand.u32 (!%p1387_p8), 1, %s1298_s19  }
  0x60   : > { %s863_s15 = sshll.u32 (!%p1387_p8), %s1516_s14, 3  ;;  %s231_s17 = scalar_lea.sflag (!%p1387_p8), [#allocation4], %s1516_s14 }
  0x61   : > { %s1522_s23 = scalar_lea.vmem (!%p1387_p8), [#allocation3], %s863_s15  ;;  %p1605_p4 = scmp.ne.s32.totalorder (!%p1387_p8), %s1598_s24, 0 }
  0x66   : > { %1281 = dma.done.wait (%p1605_p4), %s231_s17, 128  }
  0x67   : > { %1283 = vsyncadd (%p1605_p4), %s231_s17, 4294967168  ;;  %p1606_p7 = scmp.eq.s32.totalorder %s1368_s22, 0 }
  0x69   : > { %1285 = dma.done.wait (%p1606_p7), [#allocation7], 16384   ;;  %p1607_p8 = pmov %p1606_p7 }
  0x6a   : > { %v1315_v0 = vmov 0.0   ;;  %v272_v1 = vld [vmem:[#allocation6 + $0x8] sm:$0xff]  ;;  %v274_v3 = vld [vmem:[#allocation6 + $0x18] sm:$0xff]  ;;  %v271_v6 = vld [vmem:[#allocation6] sm:$0xff]  ;;  %s869_s12 = sshll.u32 %s1368_s22, 7  ;;  %s268_s13 = scalar_lea.vmem [#allocation9], %s863_s15 }
  0x6b   : > { %1287 = vsyncadd (%p1607_p8), [#allocation7], 4294950912  ;;  %421 = vmatprep.mubr.f32.mxu0 %v1315_v0  ;;  %492 = vmatprep.mubr.f32.mxu1 %v1315_v0  ;;  %v276_v2 = vld [vmem:[#allocation6 + $0x28] sm:$0xff]  ;;  %v278_v5 = vld [vmem:[#allocation6 + $0x38] sm:$0xff]  ;;  %s766_s7 = sshll.u32 %s268_s13, 4  ;;  %s1545_s8 = scalar_lea.hbm %s1594_s5, %s869_s12  ;;  %s1547_s7 = int_to_ptr.vmem [resolvable:$true] %s766_s7 }
  0x6c   : > { %v942_v4 = vpack.c.bf16 %v276_v2, %v272_v1  ;;  %v275_v7 = vld [vmem:[#allocation6 + $0x20] sm:$0xff]  ;;  %v974_v8 = vpack.c.bf16 %v278_v5, %v274_v3  ;;  %v273_v10 = vld [vmem:[#allocation6 + $0x10] sm:$0xff]  ;;  %v280_v12 = vld [vmem:[#allocation6 + $0x48] sm:$0xff]  ;;  %s753_s9 = scalar_lea.sflag [#allocation5], %s1516_s14  ;;  %s1236_s11 = scalar_lea.vmem %s1547_s7, 128 }
  0x6d   : > { %v944_v9 = vpack.c.bf16 %v275_v7, %v271_v6  ;;  %v277_v11 = vld [vmem:[#allocation6 + $0x30] sm:$0xff]  ;;  %v284_v14 = vld [vmem:[#allocation6 + $0x68] sm:$0xff]  ;;  %v282_v15 = vld [vmem:[#allocation6 + $0x58] sm:$0xff]  ;;  %p1237_p11 = scmp.ne.s32.totalorder %s1547_s7, %s1236_s11  ;;  %p1608_p0 = scmp.ne.s32.totalorder %s1603_s30, 0 }
  0x6e   : > { %943 = vmatprep.subr.bf16.mxu0 %v942_v4  ;;  %v976_v13 = vpack.c.bf16 %v277_v11, %v273_v10  ;;  %v286_v16 = vld [vmem:[#allocation6 + $0x78] sm:$0xff]  ;;  %975 = vmatprep.subr.bf16.mxu1 %v974_v8  ;;  %v946_v17 = vpack.c.bf16 %v284_v14, %v280_v12  ;;  %v279_v19 = vld [vmem:[#allocation6 + $0x40] sm:$0xff]  ;;  %v281_v21 = vld [vmem:[#allocation6 + $0x50] sm:$0xff]  ;;  %s1316_s22 = smov [#allocation9]  }
  0x6f   : > { %945 = vmatpush1.bf16.msra.mxu0 %v944_v9  ;;  %v978_v18 = vpack.c.bf16 %v286_v16, %v282_v15  ;;  %v283_v20 = vld [vmem:[#allocation6 + $0x60] sm:$0xff]  ;;  %v285_v23 = vld [vmem:[#allocation6 + $0x70] sm:$0xff]  ;;  %v288_v24 = vld [vmem:[#allocation6 + $0x88] sm:$0xff]  ;;  %p1238_p1 = pnand %p1237_p11, %p1608_p0  ;;  %s1240_s15 = sshll.u32 %s1316_s22, 4  ;;  %s1241_s15 = int_to_ptr.vmem [resolvable:$false] %s1240_s15 }
  0x70   : > { %977 = vmatpush1.bf16.msra.mxu1 %v976_v13  ;;  %v948_v22 = vpack.c.bf16 %v283_v20, %v279_v19  ;;  %v292_v25 = vld [vmem:[#allocation6 + $0xa8] sm:$0xff]  ;;  %947 = vmatprep.subr.bf16.mxu0 %v946_v17  ;;  %v980_v26 = vpack.c.bf16 %v285_v23, %v281_v21  ;;  %v290_v28 = vld [vmem:[#allocation6 + $0x98] sm:$0xff]  ;;  %v287_v30 = vld [vmem:[#allocation6 + $0x80] sm:$0xff]  ;;  %s1242_s17 = scalar_lea.vmem %s1241_s15, 256  ;;  %p1243_p5 = scmp.lt.s32.totalorder %s1547_s7, %s1241_s15 }
  0x71   : > { %979 = vmatprep.subr.bf16.mxu1 %v978_v18  ;;  %v950_v27 = vpack.c.bf16 %v292_v25, %v288_v24  ;;  %v294_v29 = vld [vmem:[#allocation6 + $0xb8] sm:$0xff]  ;;  %v291_v32 = vld [vmem:[#allocation6 + $0xa0] sm:$0xff]  ;;  %v289_v33 = vld [vmem:[#allocation6 + $0x90] sm:$0xff]  ;;  %p1239_p3 = pneg %p1238_p1  ;;  %p1244_p9 = scmp.lt.s32.totalorder %s1242_s17, %s1236_s11 }
  0x72   : > { %v982_v31 = vpack.c.bf16 %v294_v29, %v290_v28  ;;  %v293_v34 = vld [vmem:[#allocation6 + $0xb0] sm:$0xff]  ;;  %v952_v35 = vpack.c.bf16 %v291_v32, %v287_v30  ;;  %v296_v36 = vld [vmem:[#allocation6 + $0xc8] sm:$0xff]  ;;  %v298_v38 = vld [vmem:[#allocation6 + $0xd8] sm:$0xff] }
  0x73   : > { %949 = vmatpush1.bf16.msra.mxu0 %v948_v22  ;;  %v300_v37 = vld [vmem:[#allocation6 + $0xe8] sm:$0xff]  ;;  %v984_v39 = vpack.c.bf16 %v293_v34, %v289_v33  ;;  %v302_v41 = vld [vmem:[#allocation6 + $0xf8] sm:$0xff]  ;;  %v295_v42 = vld [vmem:[#allocation6 + $0xc0] sm:$0xff]  ;;  %p1245_p12 = por %p1244_p9, %p1243_p5 }
  0x74   : > { %981 = vmatpush1.bf16.msra.mxu1 %v980_v26  ;;  %951 = vmatprep.subr.bf16.mxu0 %v950_v27  ;;  %v954_v40 = vpack.c.bf16 %v300_v37, %v296_v36  ;;  %v299_v43 = vld [vmem:[#allocation6 + $0xe0] sm:$0xff]  ;;  %v986_v44 = vpack.c.bf16 %v302_v41, %v298_v38  ;;  %v297_v45 = vld [vmem:[#allocation6 + $0xd0] sm:$0xff]  ;;  %v304_v47 = vld [vmem:[#allocation6 + $0x108] sm:$0xff] }
  0x75   : > { %983 = vmatprep.subr.bf16.mxu1 %v982_v31  ;;  %v301_v46 = vld [vmem:[#allocation6 + $0xf0] sm:$0xff]  ;;  %v308_v48 = vld [vmem:[#allocation6 + $0x128] sm:$0xff]  ;;  %v306_v49 = vld [vmem:[#allocation6 + $0x118] sm:$0xff]  ;;  %v956_v51 = vpack.c.bf16 %v299_v43, %v295_v42  ;;  %p1246_p2 = pnand %p1245_p12, %p1239_p3 }
  0x76   : > { %v310_v50 = vld [vmem:[#allocation6 + $0x138] sm:$0xff]  ;;  %v988_v52 = vpack.c.bf16 %v301_v46, %v297_v45  ;;  %v958_v53 = vpack.c.bf16 %v308_v48, %v304_v47  ;;  %v303_v54 = vld [vmem:[#allocation6 + $0x100] sm:$0xff]  ;;  %v305_v56 = vld [vmem:[#allocation6 + $0x110] sm:$0xff] }
  0x77   : > { %953 = vmatpush1.bf16.msra.mxu0 %v952_v35  ;;  %v307_v55 = vld [vmem:[#allocation6 + $0x120] sm:$0xff]  ;;  %v990_v57 = vpack.c.bf16 %v310_v50, %v306_v49  ;;  %v309_v58 = vld [vmem:[#allocation6 + $0x130] sm:$0xff]  ;;  %v312_v59 = vld [vmem:[#allocation6 + $0x148] sm:$0xff] }
  0x78   : > { %985 = vmatpush1.bf16.msra.mxu1 %v984_v39  ;;  %955 = vmatprep.subr.bf16.mxu0 %v954_v40  ;;  %v316_v60 = vld [vmem:[#allocation6 + $0x168] sm:$0xff]  ;;  %v314_v61 = vld [vmem:[#allocation6 + $0x158] sm:$0xff]  ;;  %v960_v63 = vpack.c.bf16 %v307_v55, %v303_v54  ;;  %v992_v0 = vpack.c.bf16 %v309_v58, %v305_v56  ;;  %v311_v2 = vld [vmem:[#allocation6 + $0x140] sm:$0xff] }
  0x79   : > { %987 = vmatprep.subr.bf16.mxu1 %v986_v44  ;;  %v318_v62 = vld [vmem:[#allocation6 + $0x178] sm:$0xff]  ;;  %v962_v1 = vpack.c.bf16 %v316_v60, %v312_v59  ;;  %v315_v3 = vld [vmem:[#allocation6 + $0x160] sm:$0xff]  ;;  %v313_v4 = vld [vmem:[#allocation6 + $0x150] sm:$0xff] }
  0x7a   : > { %v994_v5 = vpack.c.bf16 %v318_v62, %v314_v61  ;;  %v317_v6 = vld [vmem:[#allocation6 + $0x170] sm:$0xff]  ;;  %v320_v7 = vld [vmem:[#allocation6 + $0x188] sm:$0xff]  ;;  %v322_v9 = vld [vmem:[#allocation6 + $0x198] sm:$0xff]  ;;  %v964_v11 = vpack.c.bf16 %v315_v3, %v311_v2 }
  0x7b   : > { %957 = vmatpush1.bf16.msra.mxu0 %v956_v51  ;;  %v324_v8 = vld [vmem:[#allocation6 + $0x1a8] sm:$0xff]  ;;  %v326_v10 = vld [vmem:[#allocation6 + $0x1b8] sm:$0xff]  ;;  %v996_v12 = vpack.c.bf16 %v317_v6, %v313_v4  ;;  %v319_v14 = vld [vmem:[#allocation6 + $0x180] sm:$0xff] }
  0x7c   : > { %989 = vmatpush1.bf16.msra.mxu1 %v988_v52  ;;  %959 = vmatprep.subr.bf16.mxu0 %v958_v53  ;;  %v966_v13 = vpack.c.bf16 %v324_v8, %v320_v7  ;;  %v323_v15 = vld [vmem:[#allocation6 + $0x1a0] sm:$0xff]  ;;  %v321_v16 = vld [vmem:[#allocation6 + $0x190] sm:$0xff]  ;;  %v998_v17 = vpack.c.bf16 %v326_v10, %v322_v9  ;;  %v328_v19 = vld [vmem:[#allocation6 + $0x1c8] sm:$0xff] }
  0x7d   : > { %991 = vmatprep.subr.bf16.mxu1 %v990_v57  ;;  %v325_v18 = vld [vmem:[#allocation6 + $0x1b0] sm:$0xff]  ;;  %v332_v20 = vld [vmem:[#allocation6 + $0x1e8] sm:$0xff]  ;;  %v330_v21 = vld [vmem:[#allocation6 + $0x1d8] sm:$0xff]  ;;  %v968_v23 = vpack.c.bf16 %v323_v15, %v319_v14 }
  0x7e   : > { %v334_v22 = vld [vmem:[#allocation6 + $0x1f8] sm:$0xff]  ;;  %v1000_v24 = vpack.c.bf16 %v325_v18, %v321_v16  ;;  %v970_v25 = vpack.c.bf16 %v332_v20, %v328_v19  ;;  %v327_v26 = vld [vmem:[#allocation6 + $0x1c0] sm:$0xff]  ;;  %v329_v28 = vld [vmem:[#allocation6 + $0x1d0] sm:$0xff] }
  0x7f   : > { %961 = vmatpush1.bf16.msra.mxu0 %v960_v63  ;;  %v331_v27 = vld [vmem:[#allocation6 + $0x1e0] sm:$0xff]  ;;  %v1002_v29 = vpack.c.bf16 %v334_v22, %v330_v21  ;;  %v333_v30 = vld [vmem:[#allocation6 + $0x1f0] sm:$0xff]  ;;  %v553_v32 = vld [vmem:[#allocation8 + $0x88] sm:$0xff] }
  0x80   : > { %993 = vmatpush1.bf16.msra.mxu1 %v992_v0  ;;  %963 = vmatprep.subr.bf16.mxu0 %v962_v1  ;;  %v552_v31 = vld [vmem:[#allocation8 + $0x80] sm:$0xff]  ;;  %v585_v34 = vld [vmem:[#allocation8 + $0x188] sm:$0xff]  ;;  %v972_v35 = vpack.c.bf16 %v331_v27, %v327_v26  ;;  %v1004_v36 = vpack.c.bf16 %v333_v30, %v329_v28  ;;  %v269_v43 = vld [vmem:[%s1522_s23] sm:$0xff] }
  0x81   : > { %995 = vmatprep.subr.bf16.mxu1 %v994_v5  ;;  %v584_v33 = vld [vmem:[#allocation8 + $0x180] sm:$0xff]  ;;  %v1006_v37 = vpack.c.bf16 %v553_v32, %v552_v31  ;;  %v537_v39 = vld [vmem:[#allocation8 + $0x8] sm:$0xff]  ;;  %v554_v46 = vld [vmem:[#allocation8 + $0x90] sm:$0xff] }
  0x82   : > { %v536_v38 = vld [vmem:[#allocation8] sm:$0xff]  ;;  %v1038_v40 = vpack.c.bf16 %v585_v34, %v584_v33  ;;  %v569_v42 = vld [vmem:[#allocation8 + $0x108] sm:$0xff]  ;;  %v555_v47 = vld [vmem:[#allocation8 + $0x98] sm:$0xff] }
  0x83   : > { %965 = vmatpush1.bf16.msra.mxu0 %v964_v11  ;;  %v568_v41 = vld [vmem:[#allocation8 + $0x100] sm:$0xff]  ;;  %v1008_v44 = vpack.c.bf16 %v537_v39, %v536_v38  ;;  %v586_v48 = vld [vmem:[#allocation8 + $0x190] sm:$0xff]  ;;  %v1010_v49 = vpack.c.bf16 %v555_v47, %v554_v46  ;;  %v587_v50 = vld [vmem:[#allocation8 + $0x198] sm:$0xff] }
  0x84   : > { %997 = vmatpush1.bf16.msra.mxu1 %v996_v12  ;;  %967 = vmatprep.subr.bf16.mxu0 %v966_v13  ;;  %v1040_v45 = vpack.c.bf16 %v569_v42, %v568_v41  ;;  %v538_v51 = vld [vmem:[#allocation8 + $0x10] sm:$0xff]  ;;  %v539_v52 = vld [vmem:[#allocation8 + $0x18] sm:$0xff]  ;;  %v1042_v53 = vpack.c.bf16 %v587_v50, %v586_v48  ;;  %v556_v58 = vld [vmem:[#allocation8 + $0xa0] sm:$0xff] }
  0x85   : > { %999 = vmatprep.subr.bf16.mxu1 %v998_v17  ;;  %v1012_v54 = vpack.c.bf16 %v539_v52, %v538_v51  ;;  %v570_v55 = vld [vmem:[#allocation8 + $0x110] sm:$0xff]  ;;  %v571_v56 = vld [vmem:[#allocation8 + $0x118] sm:$0xff]  ;;  %v557_v59 = vld [vmem:[#allocation8 + $0xa8] sm:$0xff] }
  0x86   : > { %v1044_v57 = vpack.c.bf16 %v571_v56, %v570_v55  ;;  %v588_v60 = vld [vmem:[#allocation8 + $0x1a0] sm:$0xff]  ;;  %v1014_v61 = vpack.c.bf16 %v557_v59, %v556_v58  ;;  %v589_v62 = vld [vmem:[#allocation8 + $0x1a8] sm:$0xff]  ;;  %v558_v6 = vld [vmem:[#allocation8 + $0xb0] sm:$0xff] }
  0x87   : > { %969 = vmatpush1.bf16.msra.mxu0 %v968_v23  ;;  %v540_v63 = vld [vmem:[#allocation8 + $0x20] sm:$0xff]  ;;  %v541_v0 = vld [vmem:[#allocation8 + $0x28] sm:$0xff]  ;;  %v1046_v1 = vpack.c.bf16 %v589_v62, %v588_v60  ;;  %v559_v7 = vld [vmem:[#allocation8 + $0xb8] sm:$0xff] }
  0x88   : > { %1001 = vmatpush1.bf16.msra.mxu1 %v1000_v24  ;;  %971 = vmatprep.subr.bf16.mxu0 %v970_v25  ;;  %v1016_v2 = vpack.c.bf16 %v541_v0, %v540_v63  ;;  %v572_v3 = vld [vmem:[#allocation8 + $0x120] sm:$0xff]  ;;  %v573_v4 = vld [vmem:[#allocation8 + $0x128] sm:$0xff]  ;;  %v590_v8 = vld [vmem:[#allocation8 + $0x1b0] sm:$0xff]  ;;  %v1018_v9 = vpack.c.bf16 %v559_v7, %v558_v6 }
  0x89   : > { %1003 = vmatprep.subr.bf16.mxu1 %v1002_v29  ;;  %v1048_v5 = vpack.c.bf16 %v573_v4, %v572_v3  ;;  %v591_v10 = vld [vmem:[#allocation8 + $0x1b8] sm:$0xff]  ;;  %v542_v11 = vld [vmem:[#allocation8 + $0x30] sm:$0xff]  ;;  %v560_v18 = vld [vmem:[#allocation8 + $0xc0] sm:$0xff] }
  0x8a   : > { %v543_v12 = vld [vmem:[#allocation8 + $0x38] sm:$0xff]  ;;  %v1050_v13 = vpack.c.bf16 %v591_v10, %v590_v8  ;;  %v574_v15 = vld [vmem:[#allocation8 + $0x130] sm:$0xff]  ;;  %v561_v19 = vld [vmem:[#allocation8 + $0xc8] sm:$0xff] }
  0x8b   : > { %973 = vmatpush1.bf16.msra.mxu0 %v972_v35  ;;  %v1020_v14 = vpack.c.bf16 %v543_v12, %v542_v11  ;;  %v575_v16 = vld [vmem:[#allocation8 + $0x138] sm:$0xff]  ;;  %v592_v20 = vld [vmem:[#allocation8 + $0x1c0] sm:$0xff]  ;;  %v1022_v21 = vpack.c.bf16 %v561_v19, %v560_v18  ;;  %v593_v22 = vld [vmem:[#allocation8 + $0x1c8] sm:$0xff] }
  0x8c   : > { %1005 = vmatpush1.bf16.msra.mxu1 %v1004_v36  ;;  %1007 = vmatprep.subr.bf16.mxu0 %v1006_v37  ;;  %v1052_v17 = vpack.c.bf16 %v575_v16, %v574_v15  ;;  %v544_v23 = vld [vmem:[#allocation8 + $0x40] sm:$0xff]  ;;  %v545_v24 = vld [vmem:[#allocation8 + $0x48] sm:$0xff]  ;;  %v1054_v25 = vpack.c.bf16 %v593_v22, %v592_v20  ;;  %v562_v30 = vld [vmem:[#allocation8 + $0xd0] sm:$0xff] }
  0x8d   : > { %1039 = vmatprep.subr.bf16.mxu1 %v1038_v40  ;;  %v1024_v26 = vpack.c.bf16 %v545_v24, %v544_v23  ;;  %v576_v27 = vld [vmem:[#allocation8 + $0x140] sm:$0xff]  ;;  %v577_v28 = vld [vmem:[#allocation8 + $0x148] sm:$0xff]  ;;  %v563_v31 = vld [vmem:[#allocation8 + $0xd8] sm:$0xff] }
  0x8e   : > { %422 = vmatmul.mubr.f32.vlgmr.msra.gmra.mrb[0].mxu0 %v269_v43  ;;  %v1056_v29 = vpack.c.bf16 %v577_v28, %v576_v27  ;;  %v594_v32 = vld [vmem:[#allocation8 + $0x1d0] sm:$0xff]  ;;  %v1026_v33 = vpack.c.bf16 %v563_v31, %v562_v30  ;;  %v595_v34 = vld [vmem:[#allocation8 + $0x1d8] sm:$0xff]  ;;  %v564_v42 = vld [vmem:[#allocation8 + $0xe0] sm:$0xff] }
  0x8f   : > { %493 = vmatmul.mubr.f32.vlgmr.msra.gmra.mrb[0].mxu1 %v269_v43  ;;  %1009 = vmatpush3.bf16.msra.mxu0 %v1008_v44  ;;  %v546_v35 = vld [vmem:[#allocation8 + $0x50] sm:$0xff]  ;;  %v547_v36 = vld [vmem:[#allocation8 + $0x58] sm:$0xff]  ;;  %v1058_v37 = vpack.c.bf16 %v595_v34, %v594_v32  ;;  %v565_v43 = vld [vmem:[#allocation8 + $0xe8] sm:$0xff] }
  0x90   : > { %1041 = vmatpush3.bf16.msra.mxu1 %v1040_v45  ;;  %1011 = vmatprep.subr.bf16.mxu0 %v1010_v49  ;;  %v1028_v38 = vpack.c.bf16 %v547_v36, %v546_v35  ;;  %v578_v39 = vld [vmem:[#allocation8 + $0x150] sm:$0xff]  ;;  %v579_v40 = vld [vmem:[#allocation8 + $0x158] sm:$0xff]  ;;  %v596_v44 = vld [vmem:[#allocation8 + $0x1e0] sm:$0xff]  ;;  %v1030_v45 = vpack.c.bf16 %v565_v43, %v564_v42 }
  0x91   : > { %1043 = vmatprep.subr.bf16.mxu1 %v1042_v53  ;;  %v1060_v41 = vpack.c.bf16 %v579_v40, %v578_v39  ;;  %v597_v46 = vld [vmem:[#allocation8 + $0x1e8] sm:$0xff]  ;;  %v548_v47 = vld [vmem:[#allocation8 + $0x60] sm:$0xff]  ;;  %v567_v55 = vld [vmem:[#allocation8 + $0xf8] sm:$0xff] }
  0x92   : > { %v549_v48 = vld [vmem:[#allocation8 + $0x68] sm:$0xff]  ;;  %v1062_v49 = vpack.c.bf16 %v597_v46, %v596_v44  ;;  %v580_v51 = vld [vmem:[#allocation8 + $0x160] sm:$0xff]  ;;  %v598_v56 = vld [vmem:[#allocation8 + $0x1f0] sm:$0xff] }
  0x93   : > { %1013 = vmatpush3.bf16.msra.mxu0 %v1012_v54  ;;  %v1032_v50 = vpack.c.bf16 %v549_v48, %v548_v47  ;;  %v581_v52 = vld [vmem:[#allocation8 + $0x168] sm:$0xff]  ;;  %v566_v54 = vld [vmem:[#allocation8 + $0xf0] sm:$0xff]  ;;  %v599_v58 = vld [vmem:[#allocation8 + $0x1f8] sm:$0xff] }
  0x94   : > { %1045 = vmatpush3.bf16.msra.mxu1 %v1044_v57  ;;  %1015 = vmatprep.subr.bf16.mxu0 %v1014_v61  ;;  %v1064_v53 = vpack.c.bf16 %v581_v52, %v580_v51  ;;  %v1034_v57 = vpack.c.bf16 %v567_v55, %v566_v54  ;;  %v550_v59 = vld [vmem:[#allocation8 + $0x70] sm:$0xff]  ;;  %v551_v60 = vld [vmem:[#allocation8 + $0x78] sm:$0xff]  ;;  %v1066_v61 = vpack.c.bf16 %v599_v58, %v598_v56 }
  0x95   : > { %1047 = vmatprep.subr.bf16.mxu1 %v1046_v1  ;;  %v1036_v62 = vpack.c.bf16 %v551_v60, %v550_v59  ;;  %v582_v63 = vld [vmem:[#allocation8 + $0x170] sm:$0xff]  ;;  %v583_v0 = vld [vmem:[#allocation8 + $0x178] sm:$0xff] }
  0x96   : > { %v1068_v1 = vpack.c.bf16 %v583_v0, %v582_v63  ;;  %v867_v63 = vld [vmem:[%s1593_s4] ss:$0 sm:$0xff] }
  0x97   : > { %1017 = vmatpush3.bf16.msra.mxu0 %v1016_v2  ;;  %v337_v2 = vlaneseq }
  0x98   : > { %1049 = vmatpush3.bf16.msra.mxu1 %v1048_v5  ;;  %1019 = vmatprep.subr.bf16.mxu0 %v1018_v9  ;;  %v335_v5 = vld [vmem:[%s1591_s2] sm:$0xf] }
  0x99   : > { %1051 = vmatprep.subr.bf16.mxu1 %v1050_v13  ;;  %v338_v3 = vshrl.u32 %v337_v2, 7 }
  0x9b   : > { %1021 = vmatpush3.bf16.msra.mxu0 %v1020_v14  ;;  %v339_v4 = vsub.s32 0, %v338_v3  ;;  %v347_v6 = vsub.s32 2, %v338_v3  ;;  %v343_v7 = vsub.s32 1, %v338_v3  ;;  %v351_v8 = vsub.s32 3, %v338_v3 }
  0x9c   : > { %1053 = vmatpush3.bf16.msra.mxu1 %v1052_v17  ;;  %1023 = vmatprep.subr.bf16.mxu0 %v1022_v21 }
  0x9d   : > { %1055 = vmatprep.subr.bf16.mxu1 %v1054_v25  ;;  %v340_v9 = vrot.slane %v335_v5, %v339_v4  ;;  %v348_v10 = vrot.slane %v335_v5, %v347_v6  ;;  %v344_v11 = vrot.slane %v335_v5, %v343_v7  ;;  %v352_v12 = vrot.slane %v335_v5, %v351_v8 }
  0x9f   : > { %1025 = vmatpush3.bf16.msra.mxu0 %v1024_v26 }
  0xa0   : > { %1057 = vmatpush3.bf16.msra.mxu1 %v1056_v29  ;;  %1027 = vmatprep.subr.bf16.mxu0 %v1026_v33 }
  0xa1   : > { %1059 = vmatprep.subr.bf16.mxu1 %v1058_v37 }
  0xa3   : > { %1029 = vmatpush3.bf16.msra.mxu0 %v1028_v38 }
  0xa4   : > { %1061 = vmatpush3.bf16.msra.mxu1 %v1060_v41  ;;  %1031 = vmatprep.subr.bf16.mxu0 %v1030_v45 }
  0xa5   : > { %1063 = vmatprep.subr.bf16.mxu1 %v1062_v49 }
  0xa7   : > { %1033 = vmatpush3.bf16.msra.mxu0 %v1032_v50 }
  0xa8   : > { %1065 = vmatpush3.bf16.msra.mxu1 %v1064_v53  ;;  %1035 = vmatprep.subr.bf16.mxu0 %v1034_v57 }
  0xa9   : > { %1067 = vmatprep.subr.bf16.mxu1 %v1066_v61 }
  0xab   : > { %1037 = vmatpush3.bf16.msra.mxu0 %v1036_v62 }
  0xac   : > { %1069 = vmatpush3.bf16.msra.mxu1 %v1068_v1 }
 0x161   : > { %v423_v13 = vpop.f32.mrb[0].mxu0 }
 0x162   : > { %v424_v14 = vadd.f32 %v423_v13, %v340_v9  ;;  %v494_v15 = vpop.f32.mrb[0].mxu1  ;;  %v425_v16 = vpop.f32.mrb[1].mxu0 }
 0x163   : > { %v495_v17 = vadd.f32 %v494_v15, %v348_v10  ;;  %v426_v18 = vadd.f32 %v425_v16, %v344_v11  ;;  %v496_v19 = vpop.f32.mrb[1].mxu1 }
 0x164   : > { %v499_v20 = vmul.f32 %v424_v14, %v424_v14  ;;  %v497_v21 = vadd.f32 %v496_v19, %v352_v12  ;;  %v503_v49 = vmul.f32 0.5, %v424_v14 }
 0x165   : > { %v501_v22 = vmul.f32 %v495_v17, %v495_v17  ;;  %v500_v23 = vmul.f32 %v426_v18, %v426_v18  ;;  %v504_v47 = vmul.f32 0.5, %v426_v18  ;;  %v505_v52 = vmul.f32 0.5, %v495_v17 }
 0x166   : > { %v507_v24 = vmul.f32 0.044715, %v499_v20  ;;  %v502_v25 = vmul.f32 %v497_v21, %v497_v21  ;;  %v506_v50 = vmul.f32 0.5, %v497_v21 }
 0x167   : > { %v509_v26 = vmul.f32 0.044715, %v501_v22  ;;  %v508_v27 = vmul.f32 0.044715, %v500_v23 }
 0x168   : > { %v511_v28 = vadd.f32 1.0, %v507_v24  ;;  %v510_v29 = vmul.f32 0.044715, %v502_v25 }
 0x169   : > { %v513_v30 = vadd.f32 1.0, %v509_v26  ;;  %v512_v31 = vadd.f32 1.0, %v508_v27 }
 0x16a   : > { %v515_v32 = vmul.f32 %v511_v28, %v424_v14  ;;  %v514_v33 = vadd.f32 1.0, %v510_v29 }
 0x16b   : > { %v517_v34 = vmul.f32 %v513_v30, %v495_v17  ;;  %v516_v35 = vmul.f32 %v512_v31, %v426_v18 }
 0x16c   : > { %v519_v36 = vmul.f32 0.7978846, %v515_v32  ;;  %v518_v37 = vmul.f32 %v514_v33, %v497_v21 }
 0x16d   : > { %v521_v38 = vmul.f32 0.7978846, %v517_v34  ;;  %v520_v39 = vmul.f32 0.7978846, %v516_v35 }
 0x16e   : > { %1142 = vtanh.f32 %v519_v36  ;;  %v522_v40 = vmul.f32 0.7978846, %v518_v37 }
 0x16f   : > { %1144 = vtanh.f32 %v521_v38 }
 0x170   : > { %1146 = vtanh.f32 %v520_v39 }
 0x171   : > { %1148 = vtanh.f32 %v522_v40 }
 0x178   : > { %v1143_v41 = vpop.eup %1142 }
 0x179   : > { %v1145_v42 = vpop.eup %1144  ;;  %v527_v44 = vadd.f32 1.0, %v1143_v41 }
 0x17a   : > { %v1147_v43 = vpop.eup %1146  ;;  %v529_v46 = vadd.f32 1.0, %v1145_v42 }
 0x17b   : > { %v1149_v45 = vpop.eup %1148  ;;  %v528_v48 = vadd.f32 1.0, %v1147_v43  ;;  %v531_v54 = vmul.f32 %v527_v44, %v503_v49 }
 0x17c   : > { %v530_v51 = vadd.f32 1.0, %v1149_v45  ;;  %v533_v56 = vmul.f32 %v529_v46, %v505_v52 }
 0x17d   : > { %v532_v53 = vmul.f32 %v528_v48, %v504_v47 }
 0x17e   : > { %v534_v55 = vmul.f32 %v530_v51, %v506_v50 }
 0x17f   : > { %664 = vmatprep.mubr.f32.mxu0 %v532_v53 }
 0x180   : > { %734 = vmatprep.mubr.f32.mxu1 %v534_v55  ;;  %665 = vmatmul.mubr.f32.vlgmr.msra.gmra.mrb[2].mxu0 %v531_v54 }
 0x181   : > { %735 = vmatmul.mubr.f32.vlgmr.msra.gmra.mrb[2].mxu1 %v533_v56 }
 0x253   : > { %v904_v57 = vpop.f32.mrb[2].mxu0 }
 0x254   : > { %v939_v58 = vpop.f32.mrb[2].mxu1  ;;  %v905_v59 = vpop.f32.mrb[3].mxu0 }
 0x255   : > { %v906_v60 = vadd.f32 %v905_v59, %v904_v57  ;;  %v940_v61 = vpop.f32.mrb[3].mxu1 }
 0x256   : > { %v941_v62 = vadd.f32 %v940_v61, %v939_v58 }
 0x258   : > { %v737_v0 = vadd.f32 %v941_v62, %v906_v60 }
 0x25a   : > { %v750_v1 = vadd.f32 %v867_v63, %v737_v0 }
 0x25c   : > { %751 = vst [vmem:[%s268_s13] sm:$0xff] %v750_v1 }
 0x25d   : > { %1249 = shalt.err (!%p1246_p2)
}
 0x25e   : > { %s1250_s14 = scalar_lea.hbm %s1545_s8, 128  ;;  %s1254_s26 = scalar_lea.hbm %s1594_s5, 256 }
 0x25f   : > { %p1251_p13 = scmp.ne.s32.totalorder %s1545_s8, %s1250_s14  ;;  %p1255_p4 = scmp.lt.u32.totalorder %s1545_s8, %s1594_s5 }
 0x260   : > { %p1256_p7 = scmp.lt.u32.totalorder %s1254_s26, %s1250_s14  ;;  %p1258_p11 = scmp.lt.u32.totalorder %s1250_s14, %s1545_s8 }
 0x261   : > { %p1252_p6 = pnand %p1251_p13, %p1608_p0 }
 0x262   : > { %p1257_p8 = por %p1256_p7, %p1255_p4 }
 0x263   : > { %p1253_p10 = pneg %p1252_p6 }
 0x264   : > { %p1259_p1 = por %p1258_p11, %p1257_p8 }
 0x266   : > { %p1260_p3 = pnand %p1259_p1, %p1253_p10 }
 0x268   : > { %1263 = shalt.err (!%p1260_p3)
}
 0x269   : > { %1080 = dma.vmem_to_hbm [thread:$0]  (%p1608_p0), %s1547_s7, 128, %s1545_s8, %s753_s9  }
 0x26a PF: > { %s778_s12 = sand.u32 1, %s1294_s18   ;;  %p1609_p5 = scmp.ne.s32.totalorder %s1599_s25, 0 }
 0x26b   : > { %p1610_p9 = scmp.ge.s32.totalorder %s1306_s21, 2  ;;  %s779_s13 = scalar_lea.sflag [#allocation5], %s778_s12 }
 0x26d   : > { %p1094_p12 = pnand %p1610_p9, %p1609_p5 }
 0x26f   : > { %1289 = dma.done.wait (!%p1094_p12), %s779_s13, 128  }
 0x270   : > { %1291 = vsyncadd (!%p1094_p12), %s779_s13, 4294967168  ;;  %p19_p2 = scmp.ge.s32.totalorder %s1457_s16, 4   ;;  %s1611_s18 = smov %s1298_s19 }
 0x271   : > { %s1612_s19 = smov %s1302_s20  ;;  %s1613_s20 = smov %s1466_s27 }
 0x272   : > { %s1614_s21 = smov %s1457_s16  ;;  %21 = sbr.rel (!%p19_p2) target bundleno = 6 (0x6), region = 93 }
 0x279   :  { %784 = vsyncpa [#allocation4], 1 }
 0x27a   :  { %786 = vsyncpa [#allocation4 + $0x1], 1 }
 0x27b   :  { %787 = vsyncpa [#allocation7], 1 }
 0x27c   :  { %788 = vsyncpa [#allocation5], 1 }
 0x27d   :  { %790 = vsyncpa [#allocation5 + $0x1], 1 }

</bundles_post_ra>
